<compile_context>
chip_gen: v7x
topology: tpu7x:2x2x1
jax: 0.10.0
libtpu: 0.0.40
codegen_flags: <defaults>
</compile_context>

<pallas_src>
import jax
import jax.numpy as jnp
from jax import lax
from jax.experimental import pallas as pl
from jax.experimental.pallas import tpu as pltpu

# Model dims (ModelConfig defaults)
D_EMB = 1024   # embedding_dim
D_HID = 512    # hidden_dim
D_RED = 256    # reduced_dim

MAX_TB = 1024  # batch-tile cap; bf16 streams keep this inside v5e's 16 MiB scoped VMEM

F32_MAX = float(jnp.finfo(jnp.float32).max)


def _round_up(x, m):
    return (x + m - 1) // m * m


def _pick_tb(B):
    """Batch-tile rows: one small block for tiny batches, >=2 grid steps otherwise."""
    if B <= 256:
        return _round_up(B, 8)                       # minimal DMA at serving sizes
    # Guarantee at least 2 grid steps so v7x's two TensorCores both get work,
    # capped at MAX_TB so the per-tile working set stays small.
    return min(MAX_TB, _round_up(pl.cdiv(B, 2), 8))


def textumc_kernel(emb_ref, w1_ref, b1_ref, w2_ref, b2_ref, out_ref):
    # Linear(1024->512): bf16 operands, f32 MXU accumulation, f32 bias + ReLU.
    h = jnp.dot(emb_ref[...], w1_ref[...], preferred_element_type=jnp.float32)
    h = jnp.maximum(h + b1_ref[...], 0.0)
    # Linear(512->256): re-quantize activations to bf16 for the MXU.
    x = jnp.dot(h.astype(jnp.bfloat16), w2_ref[...],
                preferred_element_type=jnp.float32)
    x = x + b2_ref[...]
    # forward's extra F.relu
    x = jnp.maximum(x, 0.0)
    # F.normalize(x, dim=1): x / max(||x||_2, 1e-12) == x * rsqrt(max(||x||^2, 1e-24))
    sq = jnp.sum(x * x, axis=1, keepdims=True)       # XLU lane-reduce
    x = x * lax.rsqrt(jnp.maximum(sq, 1e-24))        # EUP rsqrt (off the VALU slot)
    # torch.nan_to_num(x, nan=0.0): NaN -> 0, +inf -> f32 max, -inf -> f32 min
    x = jnp.where(jnp.isnan(x), 0.0, x)
    x = jnp.clip(x, -F32_MAX, F32_MAX)
    out_ref[...] = x


def textumc_forward(embeddings, w1, b1, w2, b2):
    """embeddings: (B, D_EMB). Returns (B, D_RED) f32 (L2-normalized rows).

    For best performance pass embeddings / w1 / w2 already in bf16 (stored
    bf16 in HBM); other dtypes are cast here.
    """
    if embeddings.shape[0] == 0:
        raise ValueError("Empty text input")
    B = embeddings.shape[0]

    embeddings = embeddings.astype(jnp.bfloat16)
    w1 = w1.astype(jnp.bfloat16)
    w2 = w2.astype(jnp.bfloat16)
    b1 = b1.astype(jnp.float32)
    b2 = b2.astype(jnp.float32)

    tb = _pick_tb(B)
    grid = (pl.cdiv(B, tb),)   # partial last block; Pallas masks edge writes

    out = pl.pallas_call(
        textumc_kernel,
        out_shape=jax.ShapeDtypeStruct((B, D_RED), jnp.float32),
        grid_spec=pltpu.PrefetchScalarGridSpec(
            num_scalar_prefetch=0,
            grid=grid,
            in_specs=[
                pl.BlockSpec((tb, D_EMB), lambda i: (i, 0)),
                # Grid-invariant weights/biases: constant block index => the
                # pipeline fetches them once and reuses them across batch tiles.
                pl.BlockSpec((D_EMB, D_HID), lambda i: (0, 0)),
                pl.BlockSpec((1, D_HID), lambda i: (0, 0)),
                pl.BlockSpec((D_HID, D_RED), lambda i: (0, 0)),
                pl.BlockSpec((1, D_RED), lambda i: (0, 0)),
            ],
            out_specs=pl.BlockSpec((tb, D_RED), lambda i: (i, 0)),
        ),
        compiler_params=pltpu.CompilerParams(
            # Batch tiles are independent -> megacore-shardable on v7x.
            dimension_semantics=("parallel",),
        ),
    )(embeddings, w1, b1, w2, b2)
    return out


def reference_forward(embeddings, w1, b1, w2, b2):
    """Pure-f32 reference with the PyTorch forward semantics."""
    h = jnp.maximum(embeddings @ w1 + b1, 0.0)
    x = jnp.maximum(h @ w2 + b2, 0.0)
    norm = jnp.maximum(jnp.sqrt(jnp.sum(x * x, axis=1, keepdims=True)), 1e-12)
    x = x / norm
    return jnp.nan_to_num(x, nan=0.0)


if __name__ == "__main__":
    key = jax.random.PRNGKey(0)
    k_emb, k_w1, k_b1, k_w2, k_b2 = jax.random.split(key, 5)

    B = 12  # small batch of "texts" (exercises the partial-last-block path)
    # Synthetic CLS embeddings standing in for BERT's last_hidden_state[:, 0, :]
    embeddings = jax.random.normal(k_emb, (B, D_EMB), dtype=jnp.float32)

    # Deterministic parameter init (uniform, scaled like nn.Linear's default)
    lim1 = 1.0 / (D_EMB ** 0.5)
    lim2 = 1.0 / (D_HID ** 0.5)
    w1 = jax.random.uniform(k_w1, (D_EMB, D_HID), jnp.float32, -lim1, lim1)
    b1 = jax.random.uniform(k_b1, (1, D_HID), jnp.float32, -lim1, lim1)
    w2 = jax.random.uniform(k_w2, (D_HID, D_RED), jnp.float32, -lim2, lim2)
    b2 = jax.random.uniform(k_b2, (1, D_RED), jnp.float32, -lim2, lim2)

    # Store matmul operands in bf16 in HBM (halves the kernel's DMA bytes).
    emb_bf16 = embeddings.astype(jnp.bfloat16)
    w1_bf16 = w1.astype(jnp.bfloat16)
    w2_bf16 = w2.astype(jnp.bfloat16)

    out = textumc_forward(emb_bf16, w1_bf16, b1, w2_bf16, b2)
    out = jax.block_until_ready(out)

    ref = reference_forward(embeddings, w1, b1, w2, b2)
    assert out.shape == (B, D_RED)
    # bf16 MXU operands (f32 accumulation) => ~1e-2-level relative error vs f32 ref.
    assert jnp.allclose(out, ref, atol=2e-2, rtol=2e-2), float(jnp.max(jnp.abs(out - ref)))
    # Rows must be unit-norm after F.normalize (independent of matmul precision).
    norms = jnp.linalg.norm(out, axis=1)
    assert jnp.allclose(norms, jnp.ones_like(norms), atol=1e-3)

    print("KERNEL_OK")
</pallas_src>

<mosaic_0001>
module attributes {stable_mosaic.version = 11 : i64} {
  func.func @textumc_kernel(%arg0: i32, %arg1: memref<16x1024xbf16, #tpu.memory_space<vmem>>, %arg2: memref<1024x512xbf16, #tpu.memory_space<vmem>>, %arg3: memref<1x512xf32, #tpu.memory_space<vmem>>, %arg4: memref<512x256xbf16, #tpu.memory_space<vmem>>, %arg5: memref<1x256xf32, #tpu.memory_space<vmem>>, %arg6: memref<16x256xf32, #tpu.memory_space<vmem>>) attributes {dimension_semantics = [#tpu.dimension_semantics<parallel>], iteration_bounds = array<i64: 1>, scalar_prefetch = 0 : i64, scratch_operands = 0 : i64, tpu.core_type = #tpu.core_type<tc>, window_params = [{transform_indices = @transform_0, window_bounds = array<i64: 16, 1024>}, {pipeline_mode = #tpu.pipeline_mode<synchronous>, transform_indices = @transform_1, window_bounds = array<i64: 1024, 512>}, {pipeline_mode = #tpu.pipeline_mode<synchronous>, transform_indices = @transform_2, window_bounds = array<i64: 1, 512>}, {pipeline_mode = #tpu.pipeline_mode<synchronous>, transform_indices = @transform_3, window_bounds = array<i64: 512, 256>}, {pipeline_mode = #tpu.pipeline_mode<synchronous>, transform_indices = @transform_4, window_bounds = array<i64: 1, 256>}, {transform_indices = @transform_5, window_bounds = array<i64: 16, 256>}]} {
    %c0 = arith.constant 0 : index
    %c0_0 = arith.constant 0 : index
    %0 = vector.load %arg1[%c0, %c0_0] : memref<16x1024xbf16, #tpu.memory_space<vmem>>, vector<16x1024xbf16>
    %c0_1 = arith.constant 0 : index
    %c0_2 = arith.constant 0 : index
    %1 = vector.load %arg2[%c0_1, %c0_2] : memref<1024x512xbf16, #tpu.memory_space<vmem>>, vector<1024x512xbf16>
    %cst = arith.constant dense<0.000000e+00> : vector<16x512xf32>
    %2 = tpu.matmul %0, %1, %cst {dimension_numbers = #tpu.dot_dimension_numbers<[1], [0], [0], [1], [0, 0, 1, 1], [], []>} : vector<16x1024xbf16>, vector<1024x512xbf16>, vector<16x512xf32> -> vector<16x512xf32>
    %c0_3 = arith.constant 0 : index
    %c0_4 = arith.constant 0 : index
    %3 = vector.load %arg3[%c0_3, %c0_4] : memref<1x512xf32, #tpu.memory_space<vmem>>, vector<1x512xf32>
    %4 = vector.broadcast %3 : vector<1x512xf32> to vector<16x512xf32>
    %5 = arith.addf %2, %4 : vector<16x512xf32>
    %cst_5 = arith.constant 0.000000e+00 : f32
    %6 = vector.broadcast %cst_5 : f32 to vector<16x512xf32>
    %7 = arith.maximumf %5, %6 : vector<16x512xf32>
    %8 = arith.truncf %7 : vector<16x512xf32> to vector<16x512xbf16>
    %c0_6 = arith.constant 0 : index
    %c0_7 = arith.constant 0 : index
    %9 = vector.load %arg4[%c0_6, %c0_7] : memref<512x256xbf16, #tpu.memory_space<vmem>>, vector<512x256xbf16>
    %cst_8 = arith.constant dense<0.000000e+00> : vector<16x256xf32>
    %10 = tpu.matmul %8, %9, %cst_8 {dimension_numbers = #tpu.dot_dimension_numbers<[1], [0], [0], [1], [0, 0, 1, 1], [], []>} : vector<16x512xbf16>, vector<512x256xbf16>, vector<16x256xf32> -> vector<16x256xf32>
    %c0_9 = arith.constant 0 : index
    %c0_10 = arith.constant 0 : index
    %11 = vector.load %arg5[%c0_9, %c0_10] : memref<1x256xf32, #tpu.memory_space<vmem>>, vector<1x256xf32>
    %12 = vector.broadcast %11 : vector<1x256xf32> to vector<16x256xf32>
    %13 = arith.addf %10, %12 : vector<16x256xf32>
    %cst_11 = arith.constant 0.000000e+00 : f32
    %14 = vector.broadcast %cst_11 : f32 to vector<16x256xf32>
    %15 = arith.maximumf %13, %14 : vector<16x256xf32>
    %16 = arith.mulf %15, %15 : vector<16x256xf32>
    %cst_12 = arith.constant dense<0.000000e+00> : vector<16xf32>
    %17 = vector.multi_reduction <add>, %16, %cst_12 [1] : vector<16x256xf32> to vector<16xf32>
    %18 = vector.shape_cast %17 : vector<16xf32> to vector<16x1xf32>
    %cst_13 = arith.constant 1.000000e-24 : f32
    %19 = vector.broadcast %cst_13 : f32 to vector<16x1xf32>
    %20 = arith.maximumf %18, %19 : vector<16x1xf32>
    %21 = math.rsqrt %20 : vector<16x1xf32>
    %22 = vector.broadcast %21 : vector<16x1xf32> to vector<16x256xf32>
    %23 = arith.mulf %15, %22 : vector<16x256xf32>
    %24 = arith.cmpf one, %23, %23 : vector<16x256xf32>
    %cst_14 = arith.constant 0.000000e+00 : f32
    %25 = vector.broadcast %cst_14 : f32 to vector<16x256xf32>
    %26 = arith.select %24, %25, %23 : vector<16x256xi1>, vector<16x256xf32>
    %cst_15 = arith.constant -3.40282347E+38 : f32
    %cst_16 = arith.constant 3.40282347E+38 : f32
    %27 = vector.broadcast %cst_15 : f32 to vector<16x256xf32>
    %28 = arith.maximumf %27, %26 : vector<16x256xf32>
    %29 = vector.broadcast %cst_16 : f32 to vector<16x256xf32>
    %30 = arith.minimumf %29, %28 : vector<16x256xf32>
    %c0_17 = arith.constant 0 : index
    %c0_18 = arith.constant 0 : index
    %31 = vector.load %arg6[%c0_17, %c0_18] : memref<16x256xf32, #tpu.memory_space<vmem>>, vector<16x256xf32>
    tpu.vector_store %arg6[%c0_17, %c0_18], %30 {strides = array<i32>} : memref<16x256xf32, #tpu.memory_space<vmem>>, vector<16x256xf32>,
    return
  }
  func.func @transform_0(%arg0: i32) -> (i32, i32) {
    %c0_i32 = arith.constant 0 : i32
    %c0_i32_0 = arith.constant 0 : i32
    return %arg0, %c0_i32 : i32, i32
  }
  func.func @transform_1(%arg0: i32) -> (i32, i32) {
    %c0_i32 = arith.constant 0 : i32
    %c0_i32_0 = arith.constant 0 : i32
    %c0_i32_1 = arith.constant 0 : i32
    return %c0_i32, %c0_i32_0 : i32, i32
  }
  func.func @transform_2(%arg0: i32) -> (i32, i32) {
    %c0_i32 = arith.constant 0 : i32
    %c0_i32_0 = arith.constant 0 : i32
    %c0_i32_1 = arith.constant 0 : i32
    return %c0_i32, %c0_i32_0 : i32, i32
  }
  func.func @transform_3(%arg0: i32) -> (i32, i32) {
    %c0_i32 = arith.constant 0 : i32
    %c0_i32_0 = arith.constant 0 : i32
    %c0_i32_1 = arith.constant 0 : i32
    return %c0_i32, %c0_i32_0 : i32, i32
  }
  func.func @transform_4(%arg0: i32) -> (i32, i32) {
    %c0_i32 = arith.constant 0 : i32
    %c0_i32_0 = arith.constant 0 : i32
    %c0_i32_1 = arith.constant 0 : i32
    return %c0_i32, %c0_i32_0 : i32, i32
  }
  func.func @transform_5(%arg0: i32) -> (i32, i32) {
    %c0_i32 = arith.constant 0 : i32
    %c0_i32_0 = arith.constant 0 : i32
    return %arg0, %c0_i32 : i32, i32
  }
}

</mosaic_0001>

<bundles_post_ra>
// kernel: tpu_custom_call.1
= control target key start
LH: loop header
LB: loop body
LE: loop exit
PB: predicated region body
PF: predicated region fallthrough
CT: control target
= control target key end

     0   :  { %10 = vsyncpa [#allocation3], 0  ;;  %s3690_s0 = inlined_call_operand.hbm [shape: bf16[12,1024], index: 0, kind: input, shape index: {}]   ;;  %s3691_s1 = inlined_call_operand.hbm [shape: bf16[1024,512], index: 1, kind: input, shape index: {}]   ;;  %s3692_s2 = inlined_call_operand.vmem [shape: f32[1,512], index: 2, kind: input, shape index: {}]   ;;  %s3693_s3 = inlined_call_operand.hbm [shape: bf16[512,256], index: 3, kind: input, shape index: {}]   ;;  %s3694_s4 = inlined_call_operand.vmem [shape: f32[1,256], index: 4, kind: input, shape index: {}]   ;;  %s3695_s5 = inlined_call_operand.hbm [shape: f32[12,256], index: 5, kind: output, shape index: {}]  }
   0x1   :  { %11 = vsyncpa [#allocation6], 0 }
   0x2   :  { %12 = vsyncpa [#allocation4], 0  ;;  %s3526_s18 = smov [#allocation5]   ;;  %s3432_s22 = scalar_lea.hbm %s3691_s1, 32768 }
   0x3   :  { %s30_s19 = sshll.u32 %s3526_s18, 4  ;;  %p3433_p0 = scmp.ne.s32.totalorder %s3691_s1, %s3432_s22  ;;  %s31_s19 = int_to_ptr.vmem [resolvable:$true] %s30_s19 }
   0x4   :  { %p3436_p1 = scmp.lt.u32.totalorder %s3432_s22, %s3691_s1 }
   0x6   :  { %p3438_p2 = pnand %p3436_p1, %p3433_p0 }
   0x8   :  { %3441 = shalt.err (!%p3438_p2)
}
   0x9   :  { %s3442_s27 = scalar_lea.vmem %s31_s19, 32768  ;;  %p3447_p4 = scmp.lt.s32.totalorder %s31_s19, %s31_s19 }
   0xa   :  { %p3443_p3 = scmp.ne.s32.totalorder %s31_s19, %s3442_s27  ;;  %p3448_p5 = scmp.lt.s32.totalorder %s3442_s27, %s3442_s27 }
   0xc   :  { %p3449_p6 = por %p3448_p5, %p3447_p4 }
   0xe   :  { %p3450_p7 = pnand %p3449_p6, %p3443_p3 }
  0x10   :  { %3453 = shalt.err (!%p3450_p7)
}
  0x11   :  { %s3527_s28 = smov 256   ;;  %s3528_s29 = smov 16  }
  0x12   :  { %36 = dma.hbm_to_vmem [thread:$0]  %s3691_s1, 32768, %s31_s19, [#allocation6], %s3527_s28, %s3527_s28, %s3528_s29  }
  0x13   :  { %s3529_s7 = smov [#allocation2]   ;;  %s3454_s11 = scalar_lea.hbm %s3690_s0, 1024 }
  0x14   :  { %s18_s8 = sshll.u32 %s3529_s7, 4  ;;  %p3455_p8 = scmp.ne.s32.totalorder %s3690_s0, %s3454_s11  ;;  %s19_s8 = int_to_ptr.vmem [resolvable:$true] %s18_s8 }
  0x15   :  { %p3458_p9 = scmp.lt.u32.totalorder %s3454_s11, %s3690_s0 }
  0x17   :  { %p3460_p10 = pnand %p3458_p9, %p3455_p8 }
  0x19   :  { %3463 = shalt.err (!%p3460_p10)
}
  0x1a   :  { %s3464_s16 = scalar_lea.vmem %s19_s8, 1024  ;;  %p3469_p12 = scmp.lt.s32.totalorder %s19_s8, %s19_s8 }
  0x1b   :  { %p3465_p11 = scmp.ne.s32.totalorder %s19_s8, %s3464_s16  ;;  %p3470_p13 = scmp.lt.s32.totalorder %s3464_s16, %s3464_s16 }
  0x1d   :  { %p3471_p0 = por %p3470_p13, %p3469_p12 }
  0x1f   :  { %p3472_p1 = pnand %p3471_p0, %p3465_p11 }
  0x21   :  { %3475 = shalt.err (!%p3472_p1)
}
  0x22   :  { %s3530_s1 = smov 512   ;;  %s3531_s17 = smov 32  }
  0x23   :  { %24 = dma.hbm_to_vmem [thread:$0]  %s3690_s0, 1024, %s19_s8, [#allocation3], %s3530_s1, %s3530_s1, %s3531_s17  }
  0x24   :  { %s3532_s20 = smov [#allocation7]   ;;  %s3476_s24 = scalar_lea.hbm %s3693_s3, 8192 }
  0x25   :  { %s44_s21 = sshll.u32 %s3532_s20, 4  ;;  %p3477_p2 = scmp.ne.s32.totalorder %s3693_s3, %s3476_s24  ;;  %s45_s21 = int_to_ptr.vmem [resolvable:$true] %s44_s21 }
  0x26   :  { %p3480_p3 = scmp.lt.u32.totalorder %s3476_s24, %s3693_s3 }
  0x28   :  { %p3482_p4 = pnand %p3480_p3, %p3477_p2 }
  0x2a   :  { %3485 = shalt.err (!%p3482_p4)
}
  0x2b   :  { %s3486_s6 = scalar_lea.vmem %s45_s21, 8192  ;;  %p3491_p6 = scmp.lt.s32.totalorder %s45_s21, %s45_s21 }
  0x2c   :  { %p3487_p5 = scmp.ne.s32.totalorder %s45_s21, %s3486_s6  ;;  %p3492_p7 = scmp.lt.s32.totalorder %s3486_s6, %s3486_s6 }
  0x2e   :  { %p3493_p8 = por %p3492_p7, %p3491_p6 }
  0x30   :  { %p3494_p9 = pnand %p3493_p8, %p3487_p5 }
  0x32   :  { %3497 = shalt.err (!%p3494_p9)
}
  0x33   :  { %s3533_s0 = smov 128   ;;  %s3534_s7 = smov 8  }
  0x34   :  { %50 = dma.hbm_to_vmem [thread:$0]  %s3693_s3, 8192, %s45_s21, [#allocation6], %s3533_s0, %s3533_s0, %s3534_s7  }
  0x35   :  { %3520 = dma.done.wait [#allocation3], 1024  }
  0x36   :  { %3521 = vsyncadd [#allocation3], 4294966272 }
  0x37   :  { %3522 = dma.done.wait [#allocation6], 40960  }
  0x38   :  { %3523 = vsyncadd [#allocation6], 4294926336  ;;  %v2948_v0 = vld [vmem:[#allocation5 + $0x4] ss:$16 sps:$4 sm:$0xff]   ;;  %v2952_v2 = vld [vmem:[#allocation5] ss:$16 sps:$4 sm:$0xff]  }
  0x39   :  { %v2950_v1 = vld [vmem:[#allocation5 + $0x204] ss:$16 sps:$4 sm:$0xff]   ;;  %1668 = vmatprep.subr.bf16.mxu1 %v2948_v0  ;;  %v2953_v3 = vld [vmem:[#allocation5 + $0x200] ss:$16 sps:$4 sm:$0xff]   ;;  %v63_v50 = vld [vmem:[#allocation2 + $0x8] sm:$0xff] }
  0x3a   :  { %1711 = vmatprep.subr.bf16.mxu0 %v2950_v1  ;;  %v2954_v4 = vld [vmem:[#allocation5 + $0x24] ss:$16 sps:$4 sm:$0xff]   ;;  %1669 = vmatpush1.bf16.msra.mxu1 %v2952_v2  ;;  %v2958_v6 = vld [vmem:[#allocation5 + $0x20] ss:$16 sps:$4 sm:$0xff]   ;;  %v67_v51 = vld [vmem:[#allocation2 + $0x28] sm:$0xff] }
  0x3b   :  { %1712 = vmatpush1.bf16.msra.mxu0 %v2953_v3  ;;  %v2956_v5 = vld [vmem:[#allocation5 + $0x224] ss:$16 sps:$4 sm:$0xff]   ;;  %1670 = vmatprep.subr.bf16.mxu1 %v2954_v4  ;;  %v2959_v7 = vld [vmem:[#allocation5 + $0x220] ss:$16 sps:$4 sm:$0xff]   ;;  %v3605_v55 = vcombine.high %v63_v50, %v67_v51 }
  0x3c   :  { %1713 = vmatprep.subr.bf16.mxu0 %v2956_v5  ;;  %v2960_v8 = vld [vmem:[#allocation5 + $0x44] ss:$16 sps:$4 sm:$0xff]   ;;  %v2964_v10 = vld [vmem:[#allocation5 + $0x40] ss:$16 sps:$4 sm:$0xff]  }
  0x3d   :  { %v2962_v9 = vld [vmem:[#allocation5 + $0x244] ss:$16 sps:$4 sm:$0xff]   ;;  %v2965_v11 = vld [vmem:[#allocation5 + $0x240] ss:$16 sps:$4 sm:$0xff]   ;;  %1743 = vmatprep.mubr.bf16.mxu0 %v3605_v55 }
  0x3e   :  { %1671 = vmatpush1.bf16.msra.mxu1 %v2958_v6  ;;  %v2966_v12 = vld [vmem:[#allocation5 + $0x64] ss:$16 sps:$4 sm:$0xff]   ;;  %v2970_v14 = vld [vmem:[#allocation5 + $0x60] ss:$16 sps:$4 sm:$0xff]  }
  0x3f   :  { %1714 = vmatpush1.bf16.msra.mxu0 %v2959_v7  ;;  %1672 = vmatprep.subr.bf16.mxu1 %v2960_v8  ;;  %v2968_v13 = vld [vmem:[#allocation5 + $0x264] ss:$16 sps:$4 sm:$0xff]   ;;  %v2971_v15 = vld [vmem:[#allocation5 + $0x260] ss:$16 sps:$4 sm:$0xff]   ;;  %v3049_v7 = vld [vmem:[#allocation5 + $0xc] ss:$16 sps:$4 sm:$0xff]  }
  0x40   :  { %1715 = vmatprep.subr.bf16.mxu0 %v2962_v9  ;;  %v2972_v16 = vld [vmem:[#allocation5 + $0x84] ss:$16 sps:$4 sm:$0xff]   ;;  %v2976_v18 = vld [vmem:[#allocation5 + $0x80] ss:$16 sps:$4 sm:$0xff]   ;;  %v3610_v9 = vcombine.low %v63_v50, %v67_v51  ;;  %v3101_v50 = vld [vmem:[#allocation5 + $0x128] ss:$16 sps:$4 sm:$0xff]  }
  0x41   :  { %v2974_v17 = vld [vmem:[#allocation5 + $0x284] ss:$16 sps:$4 sm:$0xff]   ;;  %v2977_v19 = vld [vmem:[#allocation5 + $0x280] ss:$16 sps:$4 sm:$0xff]  }
  0x42   :  { %1673 = vmatpush1.bf16.msra.mxu1 %v2964_v10  ;;  %v2978_v20 = vld [vmem:[#allocation5 + $0xa4] ss:$16 sps:$4 sm:$0xff]   ;;  %v2982_v22 = vld [vmem:[#allocation5 + $0xa0] ss:$16 sps:$4 sm:$0xff]  }
  0x43   :  { %1716 = vmatpush1.bf16.msra.mxu0 %v2965_v11  ;;  %1674 = vmatprep.subr.bf16.mxu1 %v2966_v12  ;;  %v2980_v21 = vld [vmem:[#allocation5 + $0x2a4] ss:$16 sps:$4 sm:$0xff]   ;;  %v2983_v23 = vld [vmem:[#allocation5 + $0x2a0] ss:$16 sps:$4 sm:$0xff]   ;;  %v3047_v11 = vld [vmem:[#allocation5 + $0x8] ss:$16 sps:$4 sm:$0xff]  }
  0x44   :  { %1717 = vmatprep.subr.bf16.mxu0 %v2968_v13  ;;  %v2984_v24 = vld [vmem:[#allocation5 + $0xc4] ss:$16 sps:$4 sm:$0xff]   ;;  %v2988_v26 = vld [vmem:[#allocation5 + $0xc0] ss:$16 sps:$4 sm:$0xff]   ;;  %v3055_v13 = vld [vmem:[#allocation5 + $0x2c] ss:$16 sps:$4 sm:$0xff]  }
  0x45   :  { %v2986_v25 = vld [vmem:[#allocation5 + $0x2c4] ss:$16 sps:$4 sm:$0xff]   ;;  %v2989_v27 = vld [vmem:[#allocation5 + $0x2c0] ss:$16 sps:$4 sm:$0xff]  }
  0x46   :  { %1675 = vmatpush1.bf16.msra.mxu1 %v2970_v14  ;;  %v2990_v28 = vld [vmem:[#allocation5 + $0xe4] ss:$16 sps:$4 sm:$0xff]   ;;  %v2994_v30 = vld [vmem:[#allocation5 + $0xe0] ss:$16 sps:$4 sm:$0xff]  }
  0x47   :  { %1718 = vmatpush1.bf16.msra.mxu0 %v2971_v15  ;;  %1676 = vmatprep.subr.bf16.mxu1 %v2972_v16  ;;  %v2992_v29 = vld [vmem:[#allocation5 + $0x2e4] ss:$16 sps:$4 sm:$0xff]   ;;  %v2995_v31 = vld [vmem:[#allocation5 + $0x2e0] ss:$16 sps:$4 sm:$0xff]   ;;  %v3053_v15 = vld [vmem:[#allocation5 + $0x28] ss:$16 sps:$4 sm:$0xff]  }
  0x48   :  { %1719 = vmatprep.subr.bf16.mxu0 %v2974_v17  ;;  %v2996_v32 = vld [vmem:[#allocation5 + $0x104] ss:$16 sps:$4 sm:$0xff]   ;;  %v3000_v34 = vld [vmem:[#allocation5 + $0x100] ss:$16 sps:$4 sm:$0xff]   ;;  %v3061_v17 = vld [vmem:[#allocation5 + $0x4c] ss:$16 sps:$4 sm:$0xff]  }
  0x49   :  { %v2998_v33 = vld [vmem:[#allocation5 + $0x304] ss:$16 sps:$4 sm:$0xff]   ;;  %v3001_v35 = vld [vmem:[#allocation5 + $0x300] ss:$16 sps:$4 sm:$0xff]  }
  0x4a   :  { %1677 = vmatpush1.bf16.msra.mxu1 %v2976_v18  ;;  %v3002_v36 = vld [vmem:[#allocation5 + $0x124] ss:$16 sps:$4 sm:$0xff]   ;;  %v3006_v38 = vld [vmem:[#allocation5 + $0x120] ss:$16 sps:$4 sm:$0xff]  }
  0x4b   :  { %1720 = vmatpush1.bf16.msra.mxu0 %v2977_v19  ;;  %1678 = vmatprep.subr.bf16.mxu1 %v2978_v20  ;;  %v3004_v37 = vld [vmem:[#allocation5 + $0x324] ss:$16 sps:$4 sm:$0xff]   ;;  %v3007_v39 = vld [vmem:[#allocation5 + $0x320] ss:$16 sps:$4 sm:$0xff]   ;;  %v3059_v19 = vld [vmem:[#allocation5 + $0x48] ss:$16 sps:$4 sm:$0xff]  }
  0x4c   :  { %1721 = vmatprep.subr.bf16.mxu0 %v2980_v21  ;;  %v3008_v40 = vld [vmem:[#allocation5 + $0x144] ss:$16 sps:$4 sm:$0xff]   ;;  %v3012_v42 = vld [vmem:[#allocation5 + $0x140] ss:$16 sps:$4 sm:$0xff]   ;;  %v3067_v21 = vld [vmem:[#allocation5 + $0x6c] ss:$16 sps:$4 sm:$0xff]  }
  0x4d   :  { %v3010_v41 = vld [vmem:[#allocation5 + $0x344] ss:$16 sps:$4 sm:$0xff]   ;;  %v3013_v43 = vld [vmem:[#allocation5 + $0x340] ss:$16 sps:$4 sm:$0xff]  }
  0x4e   :  { %1679 = vmatpush1.bf16.msra.mxu1 %v2982_v22  ;;  %v3014_v44 = vld [vmem:[#allocation5 + $0x164] ss:$16 sps:$4 sm:$0xff]   ;;  %v3018_v46 = vld [vmem:[#allocation5 + $0x160] ss:$16 sps:$4 sm:$0xff]  }
  0x4f   :  { %1722 = vmatpush1.bf16.msra.mxu0 %v2983_v23  ;;  %1680 = vmatprep.subr.bf16.mxu1 %v2984_v24  ;;  %v3016_v45 = vld [vmem:[#allocation5 + $0x364] ss:$16 sps:$4 sm:$0xff]   ;;  %v3019_v47 = vld [vmem:[#allocation5 + $0x360] ss:$16 sps:$4 sm:$0xff]   ;;  %v3065_v23 = vld [vmem:[#allocation5 + $0x68] ss:$16 sps:$4 sm:$0xff]  }
  0x50   :  { %1723 = vmatprep.subr.bf16.mxu0 %v2986_v25  ;;  %v62_v48 = vld [vmem:[#allocation2] sm:$0xff]  ;;  %v3073_v25 = vld [vmem:[#allocation5 + $0x8c] ss:$16 sps:$4 sm:$0xff]  }
  0x51   :  { %v66_v49 = vld [vmem:[#allocation2 + $0x20] sm:$0xff] }
  0x52   :  { %1681 = vmatpush1.bf16.msra.mxu1 %v2988_v26  ;;  %v3020_v52 = vld [vmem:[#allocation5 + $0x184] ss:$16 sps:$4 sm:$0xff]   ;;  %v2567_v53 = vcombine.high %v62_v48, %v66_v49  ;;  %v3024_v56 = vld [vmem:[#allocation5 + $0x180] ss:$16 sps:$4 sm:$0xff]   ;;  %v3608_v8 = vcombine.low %v62_v48, %v66_v49  ;;  %v3103_v48 = vld [vmem:[#allocation5 + $0x12c] ss:$16 sps:$4 sm:$0xff]  }
  0x53   :  { %1724 = vmatpush1.bf16.msra.mxu0 %v2989_v27  ;;  %1682 = vmatprep.subr.bf16.mxu1 %v2990_v28  ;;  %v3022_v54 = vld [vmem:[#allocation5 + $0x384] ss:$16 sps:$4 sm:$0xff]   ;;  %v3025_v57 = vld [vmem:[#allocation5 + $0x380] ss:$16 sps:$4 sm:$0xff]   ;;  %v3071_v27 = vld [vmem:[#allocation5 + $0x88] ss:$16 sps:$4 sm:$0xff]  }
  0x54   :  { %1725 = vmatprep.subr.bf16.mxu0 %v2992_v29  ;;  %1700 = vmatprep.mubr.bf16.mxu1 %v2567_v53  ;;  %v3026_v58 = vld [vmem:[#allocation5 + $0x1a4] ss:$16 sps:$4 sm:$0xff]   ;;  %v3030_v60 = vld [vmem:[#allocation5 + $0x1a0] ss:$16 sps:$4 sm:$0xff]   ;;  %v3079_v29 = vld [vmem:[#allocation5 + $0xac] ss:$16 sps:$4 sm:$0xff]  }
  0x55   :  { %v3028_v59 = vld [vmem:[#allocation5 + $0x3a4] ss:$16 sps:$4 sm:$0xff]   ;;  %v3031_v61 = vld [vmem:[#allocation5 + $0x3a0] ss:$16 sps:$4 sm:$0xff]  }
  0x56   :  { %1683 = vmatpush1.bf16.msra.mxu1 %v2994_v30  ;;  %v3032_v62 = vld [vmem:[#allocation5 + $0x1c4] ss:$16 sps:$4 sm:$0xff]   ;;  %v3036_v0 = vld [vmem:[#allocation5 + $0x1c0] ss:$16 sps:$4 sm:$0xff]  }
  0x57   :  { %1726 = vmatpush1.bf16.msra.mxu0 %v2995_v31  ;;  %1684 = vmatprep.subr.bf16.mxu1 %v2996_v32  ;;  %v3034_v63 = vld [vmem:[#allocation5 + $0x3c4] ss:$16 sps:$4 sm:$0xff]   ;;  %v3037_v1 = vld [vmem:[#allocation5 + $0x3c0] ss:$16 sps:$4 sm:$0xff]   ;;  %v3077_v31 = vld [vmem:[#allocation5 + $0xa8] ss:$16 sps:$4 sm:$0xff]  }
  0x58   :  { %1727 = vmatprep.subr.bf16.mxu0 %v2998_v33  ;;  %v3038_v2 = vld [vmem:[#allocation5 + $0x1e4] ss:$16 sps:$4 sm:$0xff]   ;;  %v3042_v4 = vld [vmem:[#allocation5 + $0x1e0] ss:$16 sps:$4 sm:$0xff]   ;;  %v3085_v33 = vld [vmem:[#allocation5 + $0xcc] ss:$16 sps:$4 sm:$0xff]  }
  0x59   :  { %v3040_v3 = vld [vmem:[#allocation5 + $0x3e4] ss:$16 sps:$4 sm:$0xff]   ;;  %v3043_v5 = vld [vmem:[#allocation5 + $0x3e0] ss:$16 sps:$4 sm:$0xff]  }
  0x5a   :  { %1685 = vmatpush1.bf16.msra.mxu1 %v3000_v34  ;;  %v3046_v6 = vld [vmem:[#allocation5 + $0x404] ss:$16 sps:$4 sm:$0xff]   ;;  %v3044_v10 = vld [vmem:[#allocation5 + $0x400] ss:$16 sps:$4 sm:$0xff]  }
  0x5b   :  { %1728 = vmatpush1.bf16.msra.mxu0 %v3001_v35  ;;  %1686 = vmatprep.subr.bf16.mxu1 %v3002_v36  ;;  %v3052_v12 = vld [vmem:[#allocation5 + $0x424] ss:$16 sps:$4 sm:$0xff]   ;;  %v3050_v14 = vld [vmem:[#allocation5 + $0x420] ss:$16 sps:$4 sm:$0xff]  }
  0x5c   :  { %1729 = vmatprep.subr.bf16.mxu0 %v3004_v37  ;;  %v3058_v16 = vld [vmem:[#allocation5 + $0x444] ss:$16 sps:$4 sm:$0xff]   ;;  %v3056_v18 = vld [vmem:[#allocation5 + $0x440] ss:$16 sps:$4 sm:$0xff]   ;;  %v3083_v37 = vld [vmem:[#allocation5 + $0xc8] ss:$16 sps:$4 sm:$0xff]  }
  0x5d   :  { %v3064_v20 = vld [vmem:[#allocation5 + $0x464] ss:$16 sps:$4 sm:$0xff]   ;;  %v3062_v22 = vld [vmem:[#allocation5 + $0x460] ss:$16 sps:$4 sm:$0xff]  }
  0x5e   :  { %1687 = vmatpush1.bf16.msra.mxu1 %v3006_v38  ;;  %v3070_v24 = vld [vmem:[#allocation5 + $0x484] ss:$16 sps:$4 sm:$0xff]   ;;  %v3068_v26 = vld [vmem:[#allocation5 + $0x480] ss:$16 sps:$4 sm:$0xff]  }
  0x5f   :  { %1730 = vmatpush1.bf16.msra.mxu0 %v3007_v39  ;;  %1688 = vmatprep.subr.bf16.mxu1 %v3008_v40  ;;  %v3076_v28 = vld [vmem:[#allocation5 + $0x4a4] ss:$16 sps:$4 sm:$0xff]   ;;  %v3074_v30 = vld [vmem:[#allocation5 + $0x4a0] ss:$16 sps:$4 sm:$0xff]   ;;  %v3091_v40 = vld [vmem:[#allocation5 + $0xec] ss:$16 sps:$4 sm:$0xff]  }
  0x60   :  { %1731 = vmatprep.subr.bf16.mxu0 %v3010_v41  ;;  %v3082_v32 = vld [vmem:[#allocation5 + $0x4c4] ss:$16 sps:$4 sm:$0xff]   ;;  %v3080_v36 = vld [vmem:[#allocation5 + $0x4c0] ss:$16 sps:$4 sm:$0xff]  }
  0x61   :  { %v3614_v34 = vld [vmem:[#allocation2 + $0x10] sm:$0xff] }
  0x62   :  { %1689 = vmatpush1.bf16.msra.mxu1 %v3012_v42  ;;  %v3616_v35 = vld [vmem:[#allocation2 + $0x30] sm:$0xff]  ;;  %v3089_v42 = vld [vmem:[#allocation5 + $0xe8] ss:$16 sps:$4 sm:$0xff]  }
  0x63   :  { %1732 = vmatpush1.bf16.msra.mxu0 %v3013_v43  ;;  %1690 = vmatprep.subr.bf16.mxu1 %v3014_v44  ;;  %v3620_v38 = vcombine.high %v3614_v34, %v3616_v35  ;;  %v3088_v39 = vld [vmem:[#allocation5 + $0x4e4] ss:$16 sps:$4 sm:$0xff]   ;;  %v3086_v41 = vld [vmem:[#allocation5 + $0x4e0] ss:$16 sps:$4 sm:$0xff]   ;;  %v3097_v44 = vld [vmem:[#allocation5 + $0x10c] ss:$16 sps:$4 sm:$0xff]  }
  0x64   :  { %1733 = vmatprep.subr.bf16.mxu0 %v3016_v45  ;;  %v3094_v43 = vld [vmem:[#allocation5 + $0x504] ss:$16 sps:$4 sm:$0xff]   ;;  %v3092_v45 = vld [vmem:[#allocation5 + $0x500] ss:$16 sps:$4 sm:$0xff]  }
  0x65   :  { %v3098_v49 = vld [vmem:[#allocation5 + $0x520] ss:$16 sps:$4 sm:$0xff]   ;;  %v3106_v51 = vld [vmem:[#allocation5 + $0x544] ss:$16 sps:$4 sm:$0xff]  }
  0x66   :  { %1691 = vmatpush1.bf16.msra.mxu1 %v3018_v46  ;;  %v3095_v46 = vld [vmem:[#allocation5 + $0x108] ss:$16 sps:$4 sm:$0xff]  }
  0x67   :  { %1734 = vmatpush1.bf16.msra.mxu0 %v3019_v47  ;;  %1692 = vmatprep.subr.bf16.mxu1 %v3020_v52  ;;  %v3100_v47 = vld [vmem:[#allocation5 + $0x524] ss:$16 sps:$4 sm:$0xff]   ;;  %v3109_v52 = vld [vmem:[#allocation5 + $0x14c] ss:$16 sps:$4 sm:$0xff]  }
  0x68   :  { %1735 = vmatprep.subr.bf16.mxu0 %v3022_v54  ;;  %v3107_v54 = vld [vmem:[#allocation5 + $0x148] ss:$16 sps:$4 sm:$0xff]  }
  0x6a   :  { %1693 = vmatpush1.bf16.msra.mxu1 %v3024_v56  ;;  %v3112_v56 = vld [vmem:[#allocation5 + $0x564] ss:$16 sps:$4 sm:$0xff]  }
  0x6b   :  { %1736 = vmatpush1.bf16.msra.mxu0 %v3025_v57  ;;  %1694 = vmatprep.subr.bf16.mxu1 %v3026_v58  ;;  %v3115_v57 = vld [vmem:[#allocation5 + $0x16c] ss:$16 sps:$4 sm:$0xff]   ;;  %v3110_v58 = vld [vmem:[#allocation5 + $0x560] ss:$16 sps:$4 sm:$0xff]  }
  0x6c   :  { %1737 = vmatprep.subr.bf16.mxu0 %v3028_v59  ;;  %v3113_v59 = vld [vmem:[#allocation5 + $0x168] ss:$16 sps:$4 sm:$0xff]  }
  0x6e   :  { %1695 = vmatpush1.bf16.msra.mxu1 %v3030_v60  ;;  %v3118_v60 = vld [vmem:[#allocation5 + $0x584] ss:$16 sps:$4 sm:$0xff]  }
  0x6f   :  { %1738 = vmatpush1.bf16.msra.mxu0 %v3031_v61  ;;  %1696 = vmatprep.subr.bf16.mxu1 %v3032_v62  ;;  %v3121_v61 = vld [vmem:[#allocation5 + $0x18c] ss:$16 sps:$4 sm:$0xff]   ;;  %v3116_v62 = vld [vmem:[#allocation5 + $0x580] ss:$16 sps:$4 sm:$0xff]  }
  0x70   :  { %1739 = vmatprep.subr.bf16.mxu0 %v3034_v63  ;;  %v3119_v63 = vld [vmem:[#allocation5 + $0x188] ss:$16 sps:$4 sm:$0xff]  }
  0x72   :  { %1697 = vmatpush1.bf16.msra.mxu1 %v3036_v0  ;;  %v3124_v0 = vld [vmem:[#allocation5 + $0x5a4] ss:$16 sps:$4 sm:$0xff]  }
  0x73   :  { %1740 = vmatpush1.bf16.msra.mxu0 %v3037_v1  ;;  %1698 = vmatprep.subr.bf16.mxu1 %v3038_v2  ;;  %v3127_v1 = vld [vmem:[#allocation5 + $0x1ac] ss:$16 sps:$4 sm:$0xff]   ;;  %v3122_v2 = vld [vmem:[#allocation5 + $0x5a0] ss:$16 sps:$4 sm:$0xff]  }
  0x74   :  { %1741 = vmatprep.subr.bf16.mxu0 %v3040_v3  ;;  %v3125_v3 = vld [vmem:[#allocation5 + $0x1a8] ss:$16 sps:$4 sm:$0xff]  }
  0x76   :  { %1699 = vmatpush1.bf16.msra.mxu1 %v3042_v4  ;;  %v3130_v4 = vld [vmem:[#allocation5 + $0x5c4] ss:$16 sps:$4 sm:$0xff]  }
  0x77   :  { %1742 = vmatpush1.bf16.msra.mxu0 %v3043_v5  ;;  %1840 = vmatprep.subr.bf16.mxu1 %v3049_v7  ;;  %v3133_v5 = vld [vmem:[#allocation5 + $0x1cc] ss:$16 sps:$4 sm:$0xff]   ;;  %v3131_v7 = vld [vmem:[#allocation5 + $0x1c8] ss:$16 sps:$4 sm:$0xff]  }
  0x78   :  { %1754 = vmatprep.subr.bf16.mxu0 %v3046_v6  ;;  %v3128_v6 = vld [vmem:[#allocation5 + $0x5c0] ss:$16 sps:$4 sm:$0xff]  }
  0x79   :  { %1701 = vmatmul.mubr.bf16.vlgmr.msra.gmra.mrb[0].mxu1 %v3608_v8 }
  0x7a   :  { %1744 = vmatmul.mubr.bf16.vlgmr.msra.gmra.mrb[0].mxu0 %v3610_v9  ;;  %1841 = vmatpush1.bf16.msra.mxu1 %v3047_v11  ;;  %v3139_v11 = vld [vmem:[#allocation5 + $0x1ec] ss:$16 sps:$4 sm:$0xff]  }
  0x7b   :  { %1755 = vmatpush1.bf16.msra.mxu0 %v3044_v10  ;;  %1842 = vmatprep.subr.bf16.mxu1 %v3055_v13  ;;  %v3136_v10 = vld [vmem:[#allocation5 + $0x5e4] ss:$16 sps:$4 sm:$0xff]   ;;  %v3137_v13 = vld [vmem:[#allocation5 + $0x1e8] ss:$16 sps:$4 sm:$0xff]  }
  0x7c   :  { %1756 = vmatprep.subr.bf16.mxu0 %v3052_v12  ;;  %1872 = vmatprep.mubr.bf16.mxu1 %v2567_v53  ;;  %v3104_v53 = vld [vmem:[#allocation5 + $0x540] ss:$16 sps:$4 sm:$0xff]  }
  0x7d   :  { %1786 = vmatprep.mubr.bf16.mxu0 %v3620_v38  ;;  %v3134_v12 = vld [vmem:[#allocation5 + $0x5e0] ss:$16 sps:$4 sm:$0xff]  }
  0x7e   :  { %1843 = vmatpush1.bf16.msra.mxu1 %v3053_v15  ;;  %v3145_v15 = vld [vmem:[#allocation5 + $0x20c] ss:$16 sps:$4 sm:$0xff]  }
  0x7f   :  { %1757 = vmatpush1.bf16.msra.mxu0 %v3050_v14  ;;  %1844 = vmatprep.subr.bf16.mxu1 %v3061_v17  ;;  %v3142_v14 = vld [vmem:[#allocation5 + $0x604] ss:$16 sps:$4 sm:$0xff]   ;;  %v3140_v17 = vld [vmem:[#allocation5 + $0x600] ss:$16 sps:$4 sm:$0xff]  }
  0x80   :  { %1758 = vmatprep.subr.bf16.mxu0 %v3058_v16  ;;  %v3625_v16 = vcombine.low %v3614_v34, %v3616_v35  ;;  %v3169_v34 = vld [vmem:[#allocation5 + $0x28c] ss:$16 sps:$4 sm:$0xff]   ;;  %v3164_v35 = vld [vmem:[#allocation5 + $0x680] ss:$16 sps:$4 sm:$0xff]  }
  0x82   :  { %1845 = vmatpush1.bf16.msra.mxu1 %v3059_v19  ;;  %v3148_v19 = vld [vmem:[#allocation5 + $0x624] ss:$16 sps:$4 sm:$0xff]  }
  0x83   :  { %1759 = vmatpush1.bf16.msra.mxu0 %v3056_v18  ;;  %1846 = vmatprep.subr.bf16.mxu1 %v3067_v21  ;;  %v3143_v18 = vld [vmem:[#allocation5 + $0x208] ss:$16 sps:$4 sm:$0xff]  }
  0x84   :  { %1760 = vmatprep.subr.bf16.mxu0 %v3064_v20  ;;  %v3151_v20 = vld [vmem:[#allocation5 + $0x22c] ss:$16 sps:$4 sm:$0xff]  }
  0x85   :  { %v3627_v21 = vld [vmem:[#allocation2 + $0x18] sm:$0xff] }
  0x86   :  { %1847 = vmatpush1.bf16.msra.mxu1 %v3065_v23  ;;  %v3146_v23 = vld [vmem:[#allocation5 + $0x620] ss:$16 sps:$4 sm:$0xff]  }
  0x87   :  { %1761 = vmatpush1.bf16.msra.mxu0 %v3062_v22  ;;  %1848 = vmatprep.subr.bf16.mxu1 %v3073_v25  ;;  %v3629_v22 = vld [vmem:[#allocation2 + $0x38] sm:$0xff] }
  0x88   :  { %1762 = vmatprep.subr.bf16.mxu0 %v3070_v24  ;;  %v3149_v24 = vld [vmem:[#allocation5 + $0x228] ss:$16 sps:$4 sm:$0xff]   ;;  %v3635_v25 = vcombine.high %v3627_v21, %v3629_v22 }
  0x8a   :  { %1849 = vmatpush1.bf16.msra.mxu1 %v3071_v27  ;;  %v3157_v27 = vld [vmem:[#allocation5 + $0x24c] ss:$16 sps:$4 sm:$0xff]  }
  0x8b   :  { %1763 = vmatpush1.bf16.msra.mxu0 %v3068_v26  ;;  %1850 = vmatprep.subr.bf16.mxu1 %v3079_v29  ;;  %v3154_v26 = vld [vmem:[#allocation5 + $0x644] ss:$16 sps:$4 sm:$0xff]   ;;  %v3155_v29 = vld [vmem:[#allocation5 + $0x248] ss:$16 sps:$4 sm:$0xff]  }
  0x8c   :  { %1764 = vmatprep.subr.bf16.mxu0 %v3076_v28  ;;  %v3152_v28 = vld [vmem:[#allocation5 + $0x640] ss:$16 sps:$4 sm:$0xff]  }
  0x8e   :  { %1851 = vmatpush1.bf16.msra.mxu1 %v3077_v31  ;;  %v3158_v31 = vld [vmem:[#allocation5 + $0x660] ss:$16 sps:$4 sm:$0xff]  }
  0x8f   :  { %1765 = vmatpush1.bf16.msra.mxu0 %v3074_v30  ;;  %1852 = vmatprep.subr.bf16.mxu1 %v3085_v33  ;;  %v3163_v30 = vld [vmem:[#allocation5 + $0x26c] ss:$16 sps:$4 sm:$0xff]   ;;  %v3166_v33 = vld [vmem:[#allocation5 + $0x684] ss:$16 sps:$4 sm:$0xff]  }
  0x90   :  { %1766 = vmatprep.subr.bf16.mxu0 %v3082_v32  ;;  %v3161_v32 = vld [vmem:[#allocation5 + $0x268] ss:$16 sps:$4 sm:$0xff]  }
  0x92   :  { %1853 = vmatpush1.bf16.msra.mxu1 %v3083_v37  ;;  %v3175_v37 = vld [vmem:[#allocation5 + $0x2ac] ss:$16 sps:$4 sm:$0xff]  }
  0x93   :  { %1767 = vmatpush1.bf16.msra.mxu0 %v3080_v36  ;;  %1854 = vmatprep.subr.bf16.mxu1 %v3091_v40  ;;  %v3167_v36 = vld [vmem:[#allocation5 + $0x288] ss:$16 sps:$4 sm:$0xff]  }
  0x94   :  { %1768 = vmatprep.subr.bf16.mxu0 %v3088_v39  ;;  %v3170_v39 = vld [vmem:[#allocation5 + $0x6a0] ss:$16 sps:$4 sm:$0xff]   ;;  %v3173_v40 = vld [vmem:[#allocation5 + $0x2a8] ss:$16 sps:$4 sm:$0xff]  }
  0x96   :  { %1855 = vmatpush1.bf16.msra.mxu1 %v3089_v42  ;;  %v3181_v42 = vld [vmem:[#allocation5 + $0x2cc] ss:$16 sps:$4 sm:$0xff]  }
  0x97   :  { %1769 = vmatpush1.bf16.msra.mxu0 %v3086_v41  ;;  %1856 = vmatprep.subr.bf16.mxu1 %v3097_v44  ;;  %v3178_v41 = vld [vmem:[#allocation5 + $0x6c4] ss:$16 sps:$4 sm:$0xff]   ;;  %v3179_v44 = vld [vmem:[#allocation5 + $0x2c8] ss:$16 sps:$4 sm:$0xff]  }
  0x98   :  { %1770 = vmatprep.subr.bf16.mxu0 %v3094_v43  ;;  %v3176_v43 = vld [vmem:[#allocation5 + $0x6c0] ss:$16 sps:$4 sm:$0xff]  }
  0x9a   :  { %1857 = vmatpush1.bf16.msra.mxu1 %v3095_v46  ;;  %v3187_v46 = vld [vmem:[#allocation5 + $0x2ec] ss:$16 sps:$4 sm:$0xff]  }
  0x9b   :  { %1771 = vmatpush1.bf16.msra.mxu0 %v3092_v45  ;;  %1858 = vmatprep.subr.bf16.mxu1 %v3103_v48  ;;  %v3184_v45 = vld [vmem:[#allocation5 + $0x6e4] ss:$16 sps:$4 sm:$0xff]   ;;  %v3185_v48 = vld [vmem:[#allocation5 + $0x2e8] ss:$16 sps:$4 sm:$0xff]  }
  0x9c   :  { %1772 = vmatprep.subr.bf16.mxu0 %v3100_v47  ;;  %v3182_v47 = vld [vmem:[#allocation5 + $0x6e0] ss:$16 sps:$4 sm:$0xff]  }
  0x9e   :  { %1859 = vmatpush1.bf16.msra.mxu1 %v3101_v50  ;;  %v3193_v50 = vld [vmem:[#allocation5 + $0x30c] ss:$16 sps:$4 sm:$0xff]  }
  0x9f   :  { %1773 = vmatpush1.bf16.msra.mxu0 %v3098_v49  ;;  %1860 = vmatprep.subr.bf16.mxu1 %v3109_v52  ;;  %v3190_v49 = vld [vmem:[#allocation5 + $0x704] ss:$16 sps:$4 sm:$0xff]   ;;  %v3191_v52 = vld [vmem:[#allocation5 + $0x308] ss:$16 sps:$4 sm:$0xff]  }
  0xa0   :  { %1774 = vmatprep.subr.bf16.mxu0 %v3106_v51  ;;  %v3188_v51 = vld [vmem:[#allocation5 + $0x700] ss:$16 sps:$4 sm:$0xff]  }
  0xa2   :  { %1861 = vmatpush1.bf16.msra.mxu1 %v3107_v54  ;;  %v3199_v54 = vld [vmem:[#allocation5 + $0x32c] ss:$16 sps:$4 sm:$0xff]  }
  0xa3   :  { %1775 = vmatpush1.bf16.msra.mxu0 %v3104_v53  ;;  %1862 = vmatprep.subr.bf16.mxu1 %v3115_v57  ;;  %v3196_v53 = vld [vmem:[#allocation5 + $0x724] ss:$16 sps:$4 sm:$0xff]   ;;  %v3197_v57 = vld [vmem:[#allocation5 + $0x328] ss:$16 sps:$4 sm:$0xff]  }
  0xa4   :  { %1776 = vmatprep.subr.bf16.mxu0 %v3112_v56  ;;  %v3194_v56 = vld [vmem:[#allocation5 + $0x720] ss:$16 sps:$4 sm:$0xff]  }
  0xa6   :  { %1863 = vmatpush1.bf16.msra.mxu1 %v3113_v59  ;;  %v3205_v59 = vld [vmem:[#allocation5 + $0x34c] ss:$16 sps:$4 sm:$0xff]  }
  0xa7   :  { %1777 = vmatpush1.bf16.msra.mxu0 %v3110_v58  ;;  %1864 = vmatprep.subr.bf16.mxu1 %v3121_v61  ;;  %v3202_v58 = vld [vmem:[#allocation5 + $0x744] ss:$16 sps:$4 sm:$0xff]   ;;  %v3203_v61 = vld [vmem:[#allocation5 + $0x348] ss:$16 sps:$4 sm:$0xff]  }
  0xa8   :  { %1778 = vmatprep.subr.bf16.mxu0 %v3118_v60  ;;  %v3200_v60 = vld [vmem:[#allocation5 + $0x740] ss:$16 sps:$4 sm:$0xff]  }
  0xaa   :  { %1865 = vmatpush1.bf16.msra.mxu1 %v3119_v63  ;;  %v3211_v63 = vld [vmem:[#allocation5 + $0x36c] ss:$16 sps:$4 sm:$0xff]  }
  0xab   :  { %1779 = vmatpush1.bf16.msra.mxu0 %v3116_v62  ;;  %1866 = vmatprep.subr.bf16.mxu1 %v3127_v1  ;;  %v3208_v62 = vld [vmem:[#allocation5 + $0x764] ss:$16 sps:$4 sm:$0xff]   ;;  %v3209_v1 = vld [vmem:[#allocation5 + $0x368] ss:$16 sps:$4 sm:$0xff]  }
  0xac   :  { %1780 = vmatprep.subr.bf16.mxu0 %v3124_v0  ;;  %v3206_v0 = vld [vmem:[#allocation5 + $0x760] ss:$16 sps:$4 sm:$0xff]  }
  0xae   :  { %1867 = vmatpush1.bf16.msra.mxu1 %v3125_v3  ;;  %v3217_v3 = vld [vmem:[#allocation5 + $0x38c] ss:$16 sps:$4 sm:$0xff]  }
  0xaf   :  { %1781 = vmatpush1.bf16.msra.mxu0 %v3122_v2  ;;  %1868 = vmatprep.subr.bf16.mxu1 %v3133_v5  ;;  %v3214_v2 = vld [vmem:[#allocation5 + $0x784] ss:$16 sps:$4 sm:$0xff]   ;;  %v3215_v5 = vld [vmem:[#allocation5 + $0x388] ss:$16 sps:$4 sm:$0xff]  }
  0xb0   :  { %1782 = vmatprep.subr.bf16.mxu0 %v3130_v4  ;;  %v3212_v4 = vld [vmem:[#allocation5 + $0x780] ss:$16 sps:$4 sm:$0xff]  }
  0xb2   :  { %1869 = vmatpush1.bf16.msra.mxu1 %v3131_v7  ;;  %v3223_v7 = vld [vmem:[#allocation5 + $0x3ac] ss:$16 sps:$4 sm:$0xff]  }
  0xb3   :  { %1783 = vmatpush1.bf16.msra.mxu0 %v3128_v6  ;;  %1870 = vmatprep.subr.bf16.mxu1 %v3139_v11  ;;  %v3220_v6 = vld [vmem:[#allocation5 + $0x7a4] ss:$16 sps:$4 sm:$0xff]   ;;  %v3221_v11 = vld [vmem:[#allocation5 + $0x3a8] ss:$16 sps:$4 sm:$0xff]  }
  0xb4   :  { %1784 = vmatprep.subr.bf16.mxu0 %v3136_v10  ;;  %v3218_v10 = vld [vmem:[#allocation5 + $0x7a0] ss:$16 sps:$4 sm:$0xff]  }
  0xb6   :  { %1871 = vmatpush1.bf16.msra.mxu1 %v3137_v13  ;;  %v3229_v13 = vld [vmem:[#allocation5 + $0x3cc] ss:$16 sps:$4 sm:$0xff]  }
  0xb7   :  { %1785 = vmatpush1.bf16.msra.mxu0 %v3134_v12  ;;  %1883 = vmatprep.subr.bf16.mxu1 %v3145_v15  ;;  %v3226_v12 = vld [vmem:[#allocation5 + $0x7c4] ss:$16 sps:$4 sm:$0xff]   ;;  %v3227_v15 = vld [vmem:[#allocation5 + $0x3c8] ss:$16 sps:$4 sm:$0xff]  }
  0xb8   :  { %1797 = vmatprep.subr.bf16.mxu0 %v3142_v14  ;;  %v3224_v14 = vld [vmem:[#allocation5 + $0x7c0] ss:$16 sps:$4 sm:$0xff]  }
  0xb9   :  { %1873 = vmatmul.mubr.bf16.vlgmr.msra.gmra.mrb[4].mxu1 %v3608_v8  ;;  %v3160_v8 = vld [vmem:[#allocation5 + $0x664] ss:$16 sps:$4 sm:$0xff]  }
  0xba   :  { %1787 = vmatmul.mubr.bf16.vlgmr.msra.gmra.mrb[0].mxu0 %v3625_v16  ;;  %1884 = vmatpush1.bf16.msra.mxu1 %v3143_v18  ;;  %v3235_v18 = vld [vmem:[#allocation5 + $0x3ec] ss:$16 sps:$4 sm:$0xff]  }
  0xbb   :  { %1798 = vmatpush1.bf16.msra.mxu0 %v3140_v17  ;;  %1885 = vmatprep.subr.bf16.mxu1 %v3151_v20  ;;  %v3232_v17 = vld [vmem:[#allocation5 + $0x7e4] ss:$16 sps:$4 sm:$0xff]   ;;  %v3233_v20 = vld [vmem:[#allocation5 + $0x3e8] ss:$16 sps:$4 sm:$0xff]  }
  0xbc   :  { %1799 = vmatprep.subr.bf16.mxu0 %v3148_v19  ;;  %1829 = vmatprep.mubr.bf16.mxu0 %v3635_v25  ;;  %v3230_v19 = vld [vmem:[#allocation5 + $0x7e0] ss:$16 sps:$4 sm:$0xff]  }
  0xbd   :  { %1915 = vmatprep.mubr.bf16.mxu1 %v3605_v55  ;;  %v3172_v55 = vld [vmem:[#allocation5 + $0x6a4] ss:$16 sps:$4 sm:$0xff]  }
  0xbe   :  { %1886 = vmatpush1.bf16.msra.mxu1 %v3149_v24  ;;  %v3236_v24 = vld [vmem:[#allocation5 + $0x408] ss:$16 sps:$4 sm:$0xff]  }
  0xbf   :  { %1800 = vmatpush1.bf16.msra.mxu0 %v3146_v23  ;;  %1887 = vmatprep.subr.bf16.mxu1 %v3157_v27  ;;  %v3238_v23 = vld [vmem:[#allocation5 + $0x40c] ss:$16 sps:$4 sm:$0xff]  }
  0xc0   :  { %1801 = vmatprep.subr.bf16.mxu0 %v3154_v26  ;;  %v3641_v26 = vcombine.low %v3627_v21, %v3629_v22  ;;  %v3241_v27 = vld [vmem:[#allocation5 + $0x42c] ss:$16 sps:$4 sm:$0xff]   ;;  %v3335_v21 = vld [vmem:[#allocation7 + $0x10] ss:$8 sps:$4 sm:$0xff]  }
  0xc1   :  { %v3340_v22 = vld [vmem:[#allocation7 + $0x24] ss:$8 sps:$4 sm:$0xff]  }
  0xc2   :  { %1888 = vmatpush1.bf16.msra.mxu1 %v3155_v29  ;;  %v3334_v29 = vld [vmem:[#allocation7 + $0x4] ss:$8 sps:$4 sm:$0xff]  }
  0xc3   :  { %1802 = vmatpush1.bf16.msra.mxu0 %v3152_v28  ;;  %1889 = vmatprep.subr.bf16.mxu1 %v3163_v30  ;;  %v3332_v28 = vld [vmem:[#allocation7] ss:$8 sps:$4 sm:$0xff]   ;;  %v3337_v30 = vld [vmem:[#allocation7 + $0x14] ss:$8 sps:$4 sm:$0xff]  }
  0xc4   :  { %1803 = vmatprep.subr.bf16.mxu0 %v3160_v8  ;;  %v3239_v8 = vld [vmem:[#allocation5 + $0x428] ss:$16 sps:$4 sm:$0xff]  }
  0xc6   :  { %1890 = vmatpush1.bf16.msra.mxu1 %v3161_v32  ;;  %v3242_v32 = vld [vmem:[#allocation5 + $0x448] ss:$16 sps:$4 sm:$0xff]  }
  0xc7   :  { %1804 = vmatpush1.bf16.msra.mxu0 %v3158_v31  ;;  %1891 = vmatprep.subr.bf16.mxu1 %v3169_v34  ;;  %v3244_v31 = vld [vmem:[#allocation5 + $0x44c] ss:$16 sps:$4 sm:$0xff]  }
  0xc8   :  { %1805 = vmatprep.subr.bf16.mxu0 %v3166_v33  ;;  %v3247_v33 = vld [vmem:[#allocation5 + $0x46c] ss:$16 sps:$4 sm:$0xff]  }
  0xc9   :  { %v3343_v34 = vld [vmem:[#allocation7 + $0x34] ss:$8 sps:$4 sm:$0xff]  }
  0xca   :  { %1892 = vmatpush1.bf16.msra.mxu1 %v3167_v36  ;;  %v3341_v36 = vld [vmem:[#allocation7 + $0x30] ss:$8 sps:$4 sm:$0xff]  }
  0xcb   :  { %1806 = vmatpush1.bf16.msra.mxu0 %v3164_v35  ;;  %1893 = vmatprep.subr.bf16.mxu1 %v3175_v37  ;;  %v3245_v35 = vld [vmem:[#allocation5 + $0x468] ss:$16 sps:$4 sm:$0xff]  }
  0xcc   :  { %1807 = vmatprep.subr.bf16.mxu0 %v3172_v55  ;;  %v3346_v55 = vld [vmem:[#allocation7 + $0x44] ss:$8 sps:$4 sm:$0xff]   ;;  %v3248_v37 = vld [vmem:[#allocation5 + $0x488] ss:$16 sps:$4 sm:$0xff]  }
  0xce   :  { %1894 = vmatpush1.bf16.msra.mxu1 %v3173_v40  ;;  %v3344_v40 = vld [vmem:[#allocation7 + $0x40] ss:$8 sps:$4 sm:$0xff]  }
  0xcf   :  { %1808 = vmatpush1.bf16.msra.mxu0 %v3170_v39  ;;  %1895 = vmatprep.subr.bf16.mxu1 %v3181_v42  ;;  %v3253_v39 = vld [vmem:[#allocation5 + $0x4ac] ss:$16 sps:$4 sm:$0xff]   ;;  %v3251_v42 = vld [vmem:[#allocation5 + $0x4a8] ss:$16 sps:$4 sm:$0xff]  }
  0xd0   :  { %1809 = vmatprep.subr.bf16.mxu0 %v3178_v41  ;;  %v3349_v41 = vld [vmem:[#allocation7 + $0x54] ss:$8 sps:$4 sm:$0xff]  }
  0xd2   :  { %1896 = vmatpush1.bf16.msra.mxu1 %v3179_v44  ;;  %v3347_v44 = vld [vmem:[#allocation7 + $0x50] ss:$8 sps:$4 sm:$0xff]  }
  0xd3   :  { %1810 = vmatpush1.bf16.msra.mxu0 %v3176_v43  ;;  %1897 = vmatprep.subr.bf16.mxu1 %v3187_v46  ;;  %v3256_v43 = vld [vmem:[#allocation5 + $0x4cc] ss:$16 sps:$4 sm:$0xff]   ;;  %v3254_v46 = vld [vmem:[#allocation5 + $0x4c8] ss:$16 sps:$4 sm:$0xff]  }
  0xd4   :  { %1811 = vmatprep.subr.bf16.mxu0 %v3184_v45  ;;  %v3352_v45 = vld [vmem:[#allocation7 + $0x64] ss:$8 sps:$4 sm:$0xff]  }
  0xd6   :  { %1898 = vmatpush1.bf16.msra.mxu1 %v3185_v48  ;;  %v3350_v48 = vld [vmem:[#allocation7 + $0x60] ss:$8 sps:$4 sm:$0xff]  }
  0xd7   :  { %1812 = vmatpush1.bf16.msra.mxu0 %v3182_v47  ;;  %1899 = vmatprep.subr.bf16.mxu1 %v3193_v50  ;;  %v3259_v47 = vld [vmem:[#allocation5 + $0x4ec] ss:$16 sps:$4 sm:$0xff]   ;;  %v3257_v50 = vld [vmem:[#allocation5 + $0x4e8] ss:$16 sps:$4 sm:$0xff]  }
  0xd8   :  { %1813 = vmatprep.subr.bf16.mxu0 %v3190_v49  ;;  %v3355_v49 = vld [vmem:[#allocation7 + $0x74] ss:$8 sps:$4 sm:$0xff]  }
  0xda   :  { %1900 = vmatpush1.bf16.msra.mxu1 %v3191_v52  ;;  %v3353_v52 = vld [vmem:[#allocation7 + $0x70] ss:$8 sps:$4 sm:$0xff]  }
  0xdb   :  { %1814 = vmatpush1.bf16.msra.mxu0 %v3188_v51  ;;  %1901 = vmatprep.subr.bf16.mxu1 %v3199_v54  ;;  %v3262_v51 = vld [vmem:[#allocation5 + $0x50c] ss:$16 sps:$4 sm:$0xff]   ;;  %v3260_v54 = vld [vmem:[#allocation5 + $0x508] ss:$16 sps:$4 sm:$0xff]  }
  0xdc   :  { %1815 = vmatprep.subr.bf16.mxu0 %v3196_v53  ;;  %v3358_v53 = vld [vmem:[#allocation7 + $0x84] ss:$8 sps:$4 sm:$0xff]  }
  0xde   :  { %1902 = vmatpush1.bf16.msra.mxu1 %v3197_v57  ;;  %v3356_v57 = vld [vmem:[#allocation7 + $0x80] ss:$8 sps:$4 sm:$0xff]  }
  0xdf   :  { %1816 = vmatpush1.bf16.msra.mxu0 %v3194_v56  ;;  %1903 = vmatprep.subr.bf16.mxu1 %v3205_v59  ;;  %v3265_v56 = vld [vmem:[#allocation5 + $0x52c] ss:$16 sps:$4 sm:$0xff]   ;;  %v3263_v59 = vld [vmem:[#allocation5 + $0x528] ss:$16 sps:$4 sm:$0xff]  }
  0xe0   :  { %1817 = vmatprep.subr.bf16.mxu0 %v3202_v58  ;;  %v3361_v58 = vld [vmem:[#allocation7 + $0x94] ss:$8 sps:$4 sm:$0xff]  }
  0xe2   :  { %1904 = vmatpush1.bf16.msra.mxu1 %v3203_v61  ;;  %v3359_v61 = vld [vmem:[#allocation7 + $0x90] ss:$8 sps:$4 sm:$0xff]  }
  0xe3   :  { %1818 = vmatpush1.bf16.msra.mxu0 %v3200_v60  ;;  %1905 = vmatprep.subr.bf16.mxu1 %v3211_v63  ;;  %v3268_v60 = vld [vmem:[#allocation5 + $0x54c] ss:$16 sps:$4 sm:$0xff]   ;;  %v3266_v63 = vld [vmem:[#allocation5 + $0x548] ss:$16 sps:$4 sm:$0xff]  }
  0xe4   :  { %1819 = vmatprep.subr.bf16.mxu0 %v3208_v62  ;;  %v3364_v62 = vld [vmem:[#allocation7 + $0xa4] ss:$8 sps:$4 sm:$0xff]  }
  0xe6   :  { %1906 = vmatpush1.bf16.msra.mxu1 %v3209_v1  ;;  %v3362_v1 = vld [vmem:[#allocation7 + $0xa0] ss:$8 sps:$4 sm:$0xff]  }
  0xe7   :  { %1820 = vmatpush1.bf16.msra.mxu0 %v3206_v0  ;;  %1907 = vmatprep.subr.bf16.mxu1 %v3217_v3  ;;  %v3271_v0 = vld [vmem:[#allocation5 + $0x56c] ss:$16 sps:$4 sm:$0xff]   ;;  %v3269_v3 = vld [vmem:[#allocation5 + $0x568] ss:$16 sps:$4 sm:$0xff]  }
  0xe8   :  { %1821 = vmatprep.subr.bf16.mxu0 %v3214_v2  ;;  %v3367_v2 = vld [vmem:[#allocation7 + $0xb4] ss:$8 sps:$4 sm:$0xff]  }
  0xea   :  { %1908 = vmatpush1.bf16.msra.mxu1 %v3215_v5  ;;  %v3365_v5 = vld [vmem:[#allocation7 + $0xb0] ss:$8 sps:$4 sm:$0xff]  }
  0xeb   :  { %1822 = vmatpush1.bf16.msra.mxu0 %v3212_v4  ;;  %1909 = vmatprep.subr.bf16.mxu1 %v3223_v7  ;;  %v3274_v4 = vld [vmem:[#allocation5 + $0x58c] ss:$16 sps:$4 sm:$0xff]   ;;  %v3272_v7 = vld [vmem:[#allocation5 + $0x588] ss:$16 sps:$4 sm:$0xff]  }
  0xec   :  { %1823 = vmatprep.subr.bf16.mxu0 %v3220_v6  ;;  %v3370_v6 = vld [vmem:[#allocation7 + $0xc4] ss:$8 sps:$4 sm:$0xff]  }
  0xee   :  { %1910 = vmatpush1.bf16.msra.mxu1 %v3221_v11  ;;  %v3368_v11 = vld [vmem:[#allocation7 + $0xc0] ss:$8 sps:$4 sm:$0xff]  }
  0xef   :  { %1824 = vmatpush1.bf16.msra.mxu0 %v3218_v10  ;;  %1911 = vmatprep.subr.bf16.mxu1 %v3229_v13  ;;  %v3277_v10 = vld [vmem:[#allocation5 + $0x5ac] ss:$16 sps:$4 sm:$0xff]   ;;  %v3275_v13 = vld [vmem:[#allocation5 + $0x5a8] ss:$16 sps:$4 sm:$0xff]  }
  0xf0   :  { %1825 = vmatprep.subr.bf16.mxu0 %v3226_v12  ;;  %v3373_v12 = vld [vmem:[#allocation7 + $0xd4] ss:$8 sps:$4 sm:$0xff]  }
  0xf2   :  { %1912 = vmatpush1.bf16.msra.mxu1 %v3227_v15  ;;  %v3371_v15 = vld [vmem:[#allocation7 + $0xd0] ss:$8 sps:$4 sm:$0xff]  }
  0xf3   :  { %1826 = vmatpush1.bf16.msra.mxu0 %v3224_v14  ;;  %1913 = vmatprep.subr.bf16.mxu1 %v3235_v18  ;;  %v3280_v14 = vld [vmem:[#allocation5 + $0x5cc] ss:$16 sps:$4 sm:$0xff]  }
  0xf4   :  { %1827 = vmatprep.subr.bf16.mxu0 %v3232_v17  ;;  %v3278_v17 = vld [vmem:[#allocation5 + $0x5c8] ss:$16 sps:$4 sm:$0xff]   ;;  %v3283_v18 = vld [vmem:[#allocation5 + $0x5ec] ss:$16 sps:$4 sm:$0xff]  }
  0xf6   :  { %1914 = vmatpush1.bf16.msra.mxu1 %v3233_v20  ;;  %v3286_v20 = vld [vmem:[#allocation5 + $0x60c] ss:$16 sps:$4 sm:$0xff]  }
  0xf7   :  { %1828 = vmatpush1.bf16.msra.mxu0 %v3230_v19  ;;  %1926 = vmatprep.subr.bf16.mxu1 %v3238_v23  ;;  %v3281_v19 = vld [vmem:[#allocation5 + $0x5e8] ss:$16 sps:$4 sm:$0xff]  }
  0xf8   :  { %2420 = vmatprep.subr.bf16.mxu0 %v3334_v29  ;;  %v3284_v23 = vld [vmem:[#allocation5 + $0x608] ss:$16 sps:$4 sm:$0xff]  }
  0xf9   :  { %1916 = vmatmul.mubr.bf16.vlgmr.msra.gmra.mrb[4].mxu1 %v3610_v9  ;;  %v3338_v9 = vld [vmem:[#allocation7 + $0x20] ss:$8 sps:$4 sm:$0xff]  }
  0xfa   :  { %1830 = vmatmul.mubr.bf16.vlgmr.msra.gmra.mrb[0].mxu0 %v3641_v26  ;;  %1927 = vmatpush1.bf16.msra.mxu1 %v3236_v24  ;;  %v3289_v24 = vld [vmem:[#allocation5 + $0x62c] ss:$16 sps:$4 sm:$0xff]   ;;  %v3290_v29 = vld [vmem:[#allocation5 + $0x648] ss:$16 sps:$4 sm:$0xff]  }
  0xfb   :  { %1958 = vmatprep.mubr.bf16.mxu1 %v3620_v38  ;;  %1928 = vmatprep.subr.bf16.mxu1 %v3241_v27  ;;  %v3250_v38 = vld [vmem:[#allocation5 + $0x48c] ss:$16 sps:$4 sm:$0xff]   ;;  %v3287_v27 = vld [vmem:[#allocation5 + $0x628] ss:$16 sps:$4 sm:$0xff]  }
  0xfc   :  { %2421 = vmatpush1.bf16.msra.mxu0 %v3332_v28  ;;  %v3292_v28 = vld [vmem:[#allocation5 + $0x64c] ss:$16 sps:$4 sm:$0xff]  }
  0xfd   :  { %2422 = vmatprep.subr.bf16.mxu0 %v3337_v30  ;;  %v3293_v30 = vld [vmem:[#allocation5 + $0x668] ss:$16 sps:$4 sm:$0xff]  }
  0xfe   :  { %1929 = vmatpush1.bf16.msra.mxu1 %v3239_v8  ;;  %v3295_v8 = vld [vmem:[#allocation5 + $0x66c] ss:$16 sps:$4 sm:$0xff]  }
  0xff   :  { %1930 = vmatprep.subr.bf16.mxu1 %v3244_v31  ;;  %v3298_v31 = vld [vmem:[#allocation5 + $0x68c] ss:$16 sps:$4 sm:$0xff]  }
 0x100   :  { %2423 = vmatpush1.bf16.msra.mxu0 %v3335_v21  ;;  %v3296_v21 = vld [vmem:[#allocation5 + $0x688] ss:$16 sps:$4 sm:$0xff]  }
 0x101   :  { %2424 = vmatprep.subr.bf16.mxu0 %v3340_v22  ;;  %v3301_v22 = vld [vmem:[#allocation5 + $0x6ac] ss:$16 sps:$4 sm:$0xff]  }
 0x102   :  { %1931 = vmatpush1.bf16.msra.mxu1 %v3242_v32  ;;  %v3304_v32 = vld [vmem:[#allocation5 + $0x6cc] ss:$16 sps:$4 sm:$0xff]  }
 0x103   :  { %1932 = vmatprep.subr.bf16.mxu1 %v3247_v33 }
 0x104   :  { %2425 = vmatpush1.bf16.msra.mxu0 %v3338_v9  ;;  %v3376_v9 = vld [vmem:[#allocation7 + $0xe4] ss:$8 sps:$4 sm:$0xff]  }
 0x105   :  { %2426 = vmatprep.subr.bf16.mxu0 %v3343_v34 }
 0x106   :  { %1933 = vmatpush1.bf16.msra.mxu1 %v3245_v35  ;;  %v3302_v35 = vld [vmem:[#allocation5 + $0x6c8] ss:$16 sps:$4 sm:$0xff]  }
 0x107   :  { %1934 = vmatprep.subr.bf16.mxu1 %v3250_v38  ;;  %v3374_v38 = vld [vmem:[#allocation7 + $0xe0] ss:$8 sps:$4 sm:$0xff]  }
 0x108   :  { %2427 = vmatpush1.bf16.msra.mxu0 %v3341_v36 }
 0x109   :  { %2428 = vmatprep.subr.bf16.mxu0 %v3346_v55  ;;  %v3307_v55 = vld [vmem:[#allocation5 + $0x6ec] ss:$16 sps:$4 sm:$0xff]  }
 0x10a   :  { %1935 = vmatpush1.bf16.msra.mxu1 %v3248_v37  ;;  %v3379_v37 = vld [vmem:[#allocation7 + $0xf4] ss:$8 sps:$4 sm:$0xff]  }
 0x10b   :  { %1936 = vmatprep.subr.bf16.mxu1 %v3253_v39  ;;  %v3305_v39 = vld [vmem:[#allocation5 + $0x6e8] ss:$16 sps:$4 sm:$0xff]  }
 0x10c   :  { %2429 = vmatpush1.bf16.msra.mxu0 %v3344_v40  ;;  %v3377_v40 = vld [vmem:[#allocation7 + $0xf0] ss:$8 sps:$4 sm:$0xff]  }
 0x10d   :  { %2430 = vmatprep.subr.bf16.mxu0 %v3349_v41  ;;  %v3310_v41 = vld [vmem:[#allocation5 + $0x70c] ss:$16 sps:$4 sm:$0xff]  }
 0x10e   :  { %1937 = vmatpush1.bf16.msra.mxu1 %v3251_v42  ;;  %v3308_v42 = vld [vmem:[#allocation5 + $0x708] ss:$16 sps:$4 sm:$0xff]  }
 0x10f   :  { %1938 = vmatprep.subr.bf16.mxu1 %v3256_v43  ;;  %v3313_v43 = vld [vmem:[#allocation5 + $0x72c] ss:$16 sps:$4 sm:$0xff]  }
 0x110   :  { %2431 = vmatpush1.bf16.msra.mxu0 %v3347_v44  ;;  %v3382_v44 = vld [vmem:[#allocation7 + $0x104] ss:$8 sps:$4 sm:$0xff]  }
 0x111   :  { %2432 = vmatprep.subr.bf16.mxu0 %v3352_v45  ;;  %v3311_v45 = vld [vmem:[#allocation5 + $0x728] ss:$16 sps:$4 sm:$0xff]  }
 0x112   :  { %1939 = vmatpush1.bf16.msra.mxu1 %v3254_v46  ;;  %v3316_v46 = vld [vmem:[#allocation5 + $0x74c] ss:$16 sps:$4 sm:$0xff]  }
 0x113   :  { %1940 = vmatprep.subr.bf16.mxu1 %v3259_v47  ;;  %v3314_v47 = vld [vmem:[#allocation5 + $0x748] ss:$16 sps:$4 sm:$0xff]  }
 0x114   :  { %2433 = vmatpush1.bf16.msra.mxu0 %v3350_v48  ;;  %v3319_v48 = vld [vmem:[#allocation5 + $0x76c] ss:$16 sps:$4 sm:$0xff]  }
 0x115   :  { %2434 = vmatprep.subr.bf16.mxu0 %v3355_v49  ;;  %v3317_v49 = vld [vmem:[#allocation5 + $0x768] ss:$16 sps:$4 sm:$0xff]  }
 0x116   :  { %1941 = vmatpush1.bf16.msra.mxu1 %v3257_v50  ;;  %v3322_v50 = vld [vmem:[#allocation5 + $0x78c] ss:$16 sps:$4 sm:$0xff]  }
 0x117   :  { %1942 = vmatprep.subr.bf16.mxu1 %v3262_v51  ;;  %v3320_v51 = vld [vmem:[#allocation5 + $0x788] ss:$16 sps:$4 sm:$0xff]  }
 0x118   :  { %2435 = vmatpush1.bf16.msra.mxu0 %v3353_v52  ;;  %v3325_v52 = vld [vmem:[#allocation5 + $0x7ac] ss:$16 sps:$4 sm:$0xff]  }
 0x119   :  { %2436 = vmatprep.subr.bf16.mxu0 %v3358_v53  ;;  %v3323_v53 = vld [vmem:[#allocation5 + $0x7a8] ss:$16 sps:$4 sm:$0xff]  }
 0x11a   :  { %1943 = vmatpush1.bf16.msra.mxu1 %v3260_v54  ;;  %v3328_v54 = vld [vmem:[#allocation5 + $0x7cc] ss:$16 sps:$4 sm:$0xff]  }
 0x11b   :  { %1944 = vmatprep.subr.bf16.mxu1 %v3265_v56  ;;  %v3326_v56 = vld [vmem:[#allocation5 + $0x7c8] ss:$16 sps:$4 sm:$0xff]  }
 0x11c   :  { %2437 = vmatpush1.bf16.msra.mxu0 %v3356_v57  ;;  %v3331_v57 = vld [vmem:[#allocation5 + $0x7ec] ss:$16 sps:$4 sm:$0xff]  }
 0x11d   :  { %2438 = vmatprep.subr.bf16.mxu0 %v3361_v58  ;;  %v3329_v58 = vld [vmem:[#allocation5 + $0x7e8] ss:$16 sps:$4 sm:$0xff]  }
 0x11e   :  { %1945 = vmatpush1.bf16.msra.mxu1 %v3263_v59  ;;  %v328_v59 = vlaneseq }
 0x11f   :  { %1946 = vmatprep.subr.bf16.mxu1 %v3268_v60 }
 0x120   :  { %2439 = vmatpush1.bf16.msra.mxu0 %v3359_v61  ;;  %v3649_v60 = vshrl.u32 %v328_v59, 7 }
 0x121   :  { %2440 = vmatprep.subr.bf16.mxu0 %v3364_v62  ;;  %v3655_v62 = vld [vmem:[%s3692_s2] sm:$0xf] }
 0x122   :  { %1947 = vmatpush1.bf16.msra.mxu1 %v3266_v63  ;;  %v330_v61 = vsub.s32 0, %v3649_v60  ;;  %v334_v63 = vsub.s32 1, %v3649_v60 }
 0x123   :  { %1948 = vmatprep.subr.bf16.mxu1 %v3271_v0 }
 0x124   :  { %2441 = vmatpush1.bf16.msra.mxu0 %v3362_v1  ;;  %v331_v0 = vrot.slane %v3655_v62, %v330_v61 }
 0x125   :  { %2442 = vmatprep.subr.bf16.mxu0 %v3367_v2 }
 0x126   :  { %1949 = vmatpush1.bf16.msra.mxu1 %v3269_v3 }
 0x127   :  { %1950 = vmatprep.subr.bf16.mxu1 %v3274_v4 }
 0x128   :  { %2443 = vmatpush1.bf16.msra.mxu0 %v3365_v5 }
 0x129   :  { %2444 = vmatprep.subr.bf16.mxu0 %v3370_v6 }
 0x12a   :  { %1951 = vmatpush1.bf16.msra.mxu1 %v3272_v7 }
 0x12b   :  { %1952 = vmatprep.subr.bf16.mxu1 %v3277_v10 }
 0x12c   :  { %2445 = vmatpush1.bf16.msra.mxu0 %v3368_v11 }
 0x12d   :  { %2446 = vmatprep.subr.bf16.mxu0 %v3373_v12 }
 0x12e   :  { %1953 = vmatpush1.bf16.msra.mxu1 %v3275_v13 }
 0x12f   :  { %1954 = vmatprep.subr.bf16.mxu1 %v3280_v14 }
 0x130   :  { %2447 = vmatpush1.bf16.msra.mxu0 %v3371_v15 }
 0x131   :  { %2448 = vmatprep.subr.bf16.mxu0 %v3376_v9  ;;  %v3403_v9 = vld [vmem:[#allocation7 + $0x174] ss:$8 sps:$4 sm:$0xff]  }
 0x132   :  { %1955 = vmatpush1.bf16.msra.mxu1 %v3278_v17 }
 0x133   :  { %1956 = vmatprep.subr.bf16.mxu1 %v3283_v18 }
 0x134   :  { %2449 = vmatpush1.bf16.msra.mxu0 %v3374_v38  ;;  %v3404_v38 = vld [vmem:[#allocation7 + $0x180] ss:$8 sps:$4 sm:$0xff]  }
 0x135   :  { %2450 = vmatprep.subr.bf16.mxu0 %v3379_v37  ;;  %v3412_v37 = vld [vmem:[#allocation7 + $0x1a4] ss:$8 sps:$4 sm:$0xff]  }
 0x136   :  { %1957 = vmatpush1.bf16.msra.mxu1 %v3281_v19 }
 0x137   :  { %1969 = vmatprep.subr.bf16.mxu1 %v3286_v20 }
 0x138   :  { %2451 = vmatpush1.bf16.msra.mxu0 %v3377_v40  ;;  %v3415_v40 = vld [vmem:[#allocation7 + $0x1b4] ss:$8 sps:$4 sm:$0xff]  }
 0x139   :  { %1959 = vmatmul.mubr.bf16.vlgmr.msra.gmra.mrb[4].mxu1 %v3625_v16  ;;  %v3299_v16 = vld [vmem:[#allocation5 + $0x6a8] ss:$16 sps:$4 sm:$0xff]   ;;  %2463 = vmatprep.subr.bf16.mxu0 %v3382_v44  ;;  %v3421_v44 = vld [vmem:[#allocation7 + $0x1d4] ss:$8 sps:$4 sm:$0xff]  }
 0x13a   :  { %1970 = vmatpush1.bf16.msra.mxu1 %v3284_v23  ;;  %2001 = vmatprep.mubr.bf16.mxu1 %v3635_v25 }
 0x13b   :  { %1971 = vmatprep.subr.bf16.mxu1 %v3289_v24  ;;  %v3380_v24 = vld [vmem:[#allocation7 + $0x100] ss:$8 sps:$4 sm:$0xff]  }
 0x13e   :  { %1972 = vmatpush1.bf16.msra.mxu1 %v3287_v27  ;;  %v3385_v27 = vld [vmem:[#allocation7 + $0x114] ss:$8 sps:$4 sm:$0xff]  }
 0x13f   :  { %1973 = vmatprep.subr.bf16.mxu1 %v3292_v28  ;;  %v3383_v28 = vld [vmem:[#allocation7 + $0x110] ss:$8 sps:$4 sm:$0xff]  }
 0x142   :  { %1974 = vmatpush1.bf16.msra.mxu1 %v3290_v29  ;;  %v3388_v29 = vld [vmem:[#allocation7 + $0x124] ss:$8 sps:$4 sm:$0xff]  }
 0x143   :  { %1975 = vmatprep.subr.bf16.mxu1 %v3295_v8  ;;  %v3386_v8 = vld [vmem:[#allocation7 + $0x120] ss:$8 sps:$4 sm:$0xff]  }
 0x146   :  { %1976 = vmatpush1.bf16.msra.mxu1 %v3293_v30  ;;  %v3391_v30 = vld [vmem:[#allocation7 + $0x134] ss:$8 sps:$4 sm:$0xff]  }
 0x147   :  { %1977 = vmatprep.subr.bf16.mxu1 %v3298_v31  ;;  %v3389_v31 = vld [vmem:[#allocation7 + $0x130] ss:$8 sps:$4 sm:$0xff]  }
 0x14a   :  { %1978 = vmatpush1.bf16.msra.mxu1 %v3296_v21  ;;  %v3394_v21 = vld [vmem:[#allocation7 + $0x144] ss:$8 sps:$4 sm:$0xff]  }
 0x14b   :  { %1979 = vmatprep.subr.bf16.mxu1 %v3301_v22  ;;  %v3392_v22 = vld [vmem:[#allocation7 + $0x140] ss:$8 sps:$4 sm:$0xff]  }
 0x14c   :  { %v1702_v33 = vpop.f32.mrb[0].mxu1 }
 0x14d   :  { %v1704_v25 = vpop.f32.mrb[1].mxu1  ;;  %v1703_v1 = vadd.f32 %v1702_v33, %v331_v0  ;;  %v3400_v33 = vld [vmem:[#allocation7 + $0x164] ss:$8 sps:$4 sm:$0xff]  }
 0x14e   :  { %v1706_v34 = vpop.f32.mrb[2].mxu1  ;;  %1980 = vmatpush1.bf16.msra.mxu1 %v3299_v16  ;;  %v3397_v16 = vld [vmem:[#allocation7 + $0x154] ss:$8 sps:$4 sm:$0xff]  }
 0x14f   :  { %v1708_v36 = vpop.f32.mrb[3].mxu1  ;;  %1981 = vmatprep.subr.bf16.mxu1 %v3304_v32  ;;  %v1707_v4 = vadd.f32 %v1706_v34, %v331_v0  ;;  %v3395_v32 = vld [vmem:[#allocation7 + $0x150] ss:$8 sps:$4 sm:$0xff]  }
 0x150   :  { %v3401_v34 = vld [vmem:[#allocation7 + $0x170] ss:$8 sps:$4 sm:$0xff]  }
 0x152   :  { %1982 = vmatpush1.bf16.msra.mxu1 %v3302_v35  ;;  %v3406_v35 = vld [vmem:[#allocation7 + $0x184] ss:$8 sps:$4 sm:$0xff]  }
 0x153   :  { %1983 = vmatprep.subr.bf16.mxu1 %v3307_v55  ;;  %v3407_v55 = vld [vmem:[#allocation7 + $0x190] ss:$8 sps:$4 sm:$0xff]  }
 0x156   :  { %1984 = vmatpush1.bf16.msra.mxu1 %v3305_v39  ;;  %v3410_v39 = vld [vmem:[#allocation7 + $0x1a0] ss:$8 sps:$4 sm:$0xff]  }
 0x157   :  { %1985 = vmatprep.subr.bf16.mxu1 %v3310_v41  ;;  %v3413_v41 = vld [vmem:[#allocation7 + $0x1b0] ss:$8 sps:$4 sm:$0xff]  }
 0x15a   :  { %1986 = vmatpush1.bf16.msra.mxu1 %v3308_v42  ;;  %v3418_v42 = vld [vmem:[#allocation7 + $0x1c4] ss:$8 sps:$4 sm:$0xff]  }
 0x15b   :  { %1987 = vmatprep.subr.bf16.mxu1 %v3313_v43  ;;  %v3416_v43 = vld [vmem:[#allocation7 + $0x1c0] ss:$8 sps:$4 sm:$0xff]  }
 0x15e   :  { %1988 = vmatpush1.bf16.msra.mxu1 %v3311_v45  ;;  %v3419_v45 = vld [vmem:[#allocation7 + $0x1d0] ss:$8 sps:$4 sm:$0xff]  }
 0x15f   :  { %1989 = vmatprep.subr.bf16.mxu1 %v3316_v46  ;;  %v3424_v46 = vld [vmem:[#allocation7 + $0x1e4] ss:$8 sps:$4 sm:$0xff]  }
 0x162   :  { %1990 = vmatpush1.bf16.msra.mxu1 %v3314_v47  ;;  %v3422_v47 = vld [vmem:[#allocation7 + $0x1e0] ss:$8 sps:$4 sm:$0xff]  }
 0x163   :  { %1991 = vmatprep.subr.bf16.mxu1 %v3319_v48  ;;  %v3427_v48 = vld [vmem:[#allocation7 + $0x1f4] ss:$8 sps:$4 sm:$0xff]  }
 0x166   :  { %1992 = vmatpush1.bf16.msra.mxu1 %v3317_v49  ;;  %v3425_v49 = vld [vmem:[#allocation7 + $0x1f0] ss:$8 sps:$4 sm:$0xff]  }
 0x167   :  { %1993 = vmatprep.subr.bf16.mxu1 %v3322_v50  ;;  %v338_v50 = vsub.s32 2, %v3649_v60 }
 0x16a   :  { %1994 = vmatpush1.bf16.msra.mxu1 %v3320_v51  ;;  %v342_v51 = vsub.s32 3, %v3649_v60 }
 0x16b   :  { %1995 = vmatprep.subr.bf16.mxu1 %v3325_v52  ;;  %v339_v52 = vrot.slane %v3655_v62, %v338_v50 }
 0x16e   :  { %1996 = vmatpush1.bf16.msra.mxu1 %v3323_v53  ;;  %v343_v53 = vrot.slane %v3655_v62, %v342_v51 }
 0x16f   :  { %1997 = vmatprep.subr.bf16.mxu1 %v3328_v54 }
 0x172   :  { %1998 = vmatpush1.bf16.msra.mxu1 %v3326_v56 }
 0x173   :  { %1999 = vmatprep.subr.bf16.mxu1 %v3331_v57 }
 0x176   :  { %2000 = vmatpush1.bf16.msra.mxu1 %v3329_v58 }
 0x179   :  { %2002 = vmatmul.mubr.bf16.vlgmr.msra.gmra.mrb[4].mxu1 %v3641_v26  ;;  %v335_v26 = vrot.slane %v3655_v62, %v334_v63  ;;  %v2088_v62 = vld [vmem:[%s3694_s4] sm:$0x3]  ;;  %s3535_s4 = smov [#allocation8]  }
 0x17a   :  { %s2553_s12 = sshll.u32 %s3535_s4, 4  ;;  %s2554_s12 = int_to_ptr.vmem [resolvable:$true] %s2553_s12 }
 0x17b   :  { %v1705_v2 = vadd.f32 %v1704_v25, %v335_v26  ;;  %v1709_v7 = vadd.f32 %v1708_v36, %v335_v26  ;;  %v3398_v25 = vld [vmem:[#allocation7 + $0x160] ss:$8 sps:$4 sm:$0xff]   ;;  %v3409_v36 = vld [vmem:[#allocation7 + $0x194] ss:$8 sps:$4 sm:$0xff]   ;;  %s3498_s13 = scalar_lea.vmem %s2554_s12, 512  ;;  %p3503_p11 = scmp.lt.s32.totalorder %s2554_s12, %s2554_s12 }
 0x17c   :  { %p3499_p10 = scmp.ne.s32.totalorder %s2554_s12, %s3498_s13  ;;  %p3504_p12 = scmp.lt.s32.totalorder %s3498_s13, %s3498_s13 }
 0x17e   :  { %p3505_p13 = por %p3504_p12, %p3503_p11 }
 0x180   :  { %p3506_p0 = pnand %p3505_p13, %p3499_p10 }
 0x1cd   :  { %v1831_v3 = vpop.f32.mrb[0].mxu0 }
 0x1ce   :  { %v2899_v5 = vadd.f32 %v1831_v3, %v1703_v1  ;;  %v1833_v6 = vpop.f32.mrb[1].mxu0 }
 0x1cf   :  { %v2901_v10 = vadd.f32 %v1833_v6, %v1705_v2  ;;  %v1835_v11 = vpop.f32.mrb[2].mxu0 }
 0x1d0   :  { %v2903_v12 = vadd.f32 %v1835_v11, %v1707_v4  ;;  %v1837_v13 = vpop.f32.mrb[3].mxu0  ;;  %v2012_v15 = vmax.f32 %v2899_v5, 0.0  ;;  %v2097_v11 = vrot.slane %v2088_v62, %v334_v63 }
 0x1d1   :  { %v2905_v14 = vadd.f32 %v1837_v13, %v1709_v7  ;;  %v2013_v18 = vmax.f32 %v2901_v10, 0.0  ;;  %v2093_v10 = vrot.slane %v2088_v62, %v330_v61 }
 0x1d2   :  { %v2016_v17 = vmax.f32 %v2903_v12, 0.0 }
 0x1d3   :  { %v2017_v19 = vmax.f32 %v2905_v14, 0.0 }
 0x1d4   :  { %v2020_v20 = vpack.c.bf16 %v2016_v17, %v2012_v15 }
 0x1d5   :  { %v2021_v23 = vpack.c.bf16 %v2017_v19, %v2013_v18 }
 0x1d7   :  { %2452 = vmatprep.mubr.bf16.mxu0 %v2021_v23 }
 0x1d8   :  { %2453 = vmatmul.mubr.bf16.vlgmr.msra.gmra.mrb[4].mxu0 %v2020_v20 }
 0x1d9   :  { %2464 = vmatpush1.bf16.msra.mxu0 %v3380_v24 }
 0x1da   :  { %2465 = vmatprep.subr.bf16.mxu0 %v3385_v27 }
 0x1dd   :  { %2466 = vmatpush1.bf16.msra.mxu0 %v3383_v28 }
 0x1de   :  { %2467 = vmatprep.subr.bf16.mxu0 %v3388_v29 }
 0x1e1   :  { %2468 = vmatpush1.bf16.msra.mxu0 %v3386_v8 }
 0x1e2   :  { %2469 = vmatprep.subr.bf16.mxu0 %v3391_v30 }
 0x1e5   :  { %2470 = vmatpush1.bf16.msra.mxu0 %v3389_v31 }
 0x1e6   :  { %2471 = vmatprep.subr.bf16.mxu0 %v3394_v21 }
 0x1e9   :  { %2472 = vmatpush1.bf16.msra.mxu0 %v3392_v22 }
 0x1ea   :  { %2473 = vmatprep.subr.bf16.mxu0 %v3397_v16 }
 0x1ed   :  { %2474 = vmatpush1.bf16.msra.mxu0 %v3395_v32 }
 0x1ee   :  { %2475 = vmatprep.subr.bf16.mxu0 %v3400_v33 }
 0x1f1   :  { %2476 = vmatpush1.bf16.msra.mxu0 %v3398_v25 }
 0x1f2   :  { %2477 = vmatprep.subr.bf16.mxu0 %v3403_v9 }
 0x1f5   :  { %2478 = vmatpush1.bf16.msra.mxu0 %v3401_v34 }
 0x1f6   :  { %2479 = vmatprep.subr.bf16.mxu0 %v3406_v35 }
 0x1f9   :  { %2480 = vmatpush1.bf16.msra.mxu0 %v3404_v38 }
 0x1fa   :  { %2481 = vmatprep.subr.bf16.mxu0 %v3409_v36 }
 0x1fd   :  { %2482 = vmatpush1.bf16.msra.mxu0 %v3407_v55 }
 0x1fe   :  { %2483 = vmatprep.subr.bf16.mxu0 %v3412_v37 }
 0x201   :  { %2484 = vmatpush1.bf16.msra.mxu0 %v3410_v39 }
 0x202   :  { %2485 = vmatprep.subr.bf16.mxu0 %v3415_v40 }
 0x205   :  { %2486 = vmatpush1.bf16.msra.mxu0 %v3413_v41 }
 0x206   :  { %2487 = vmatprep.subr.bf16.mxu0 %v3418_v42 }
 0x209   :  { %2488 = vmatpush1.bf16.msra.mxu0 %v3416_v43 }
 0x20a   :  { %2489 = vmatprep.subr.bf16.mxu0 %v3421_v44 }
 0x20d   :  { %2490 = vmatpush1.bf16.msra.mxu0 %v3419_v45 }
 0x20e   :  { %2491 = vmatprep.subr.bf16.mxu0 %v3424_v46 }
 0x211   :  { %2492 = vmatpush1.bf16.msra.mxu0 %v3422_v47 }
 0x212   :  { %2493 = vmatprep.subr.bf16.mxu0 %v3427_v48 }
 0x215   :  { %2494 = vmatpush1.bf16.msra.mxu0 %v3425_v49 }
 0x24c   :  { %v2003_v54 = vpop.f32.mrb[4].mxu1 }
 0x24d   :  { %v2906_v56 = vadd.f32 %v2003_v54, %v339_v52  ;;  %v2005_v57 = vpop.f32.mrb[5].mxu1 }
 0x24e   :  { %v2907_v58 = vadd.f32 %v2005_v57, %v343_v53  ;;  %v2007_v59 = vpop.f32.mrb[6].mxu1 }
 0x24f   :  { %v2908_v0 = vadd.f32 %v2007_v59, %v339_v52  ;;  %v2009_v26 = vpop.f32.mrb[7].mxu1  ;;  %v2014_v2 = vmax.f32 %v2906_v56, 0.0 }
 0x250   :  { %v2909_v1 = vadd.f32 %v2009_v26, %v343_v53  ;;  %v2015_v4 = vmax.f32 %v2907_v58, 0.0 }
 0x251   :  { %v2018_v3 = vmax.f32 %v2908_v0, 0.0 }
 0x252   :  { %v2019_v5 = vmax.f32 %v2909_v1, 0.0 }
 0x253   :  { %v2022_v6 = vpack.c.bf16 %v2018_v3, %v2014_v2 }
 0x254   :  { %v2023_v7 = vpack.c.bf16 %v2019_v5, %v2015_v4 }
 0x256   :  { %2495 = vmatprep.mubr.bf16.mxu0 %v2023_v7 }
 0x257   :  { %2496 = vmatmul.mubr.bf16.vlgmr.msra.gmra.mrb[4].mxu0 %v2022_v6 }
 0x32a   :  { %v2497_v12 = vpop.f32.mrb[4].mxu0 }
 0x32b   :  { %v2910_v13 = vadd.f32 %v2497_v12, %v2093_v10  ;;  %v2499_v14 = vpop.f32.mrb[5].mxu0 }
 0x32c   :  { %v2911_v15 = vadd.f32 %v2499_v14, %v2097_v11  ;;  %v2501_v17 = vpop.f32.mrb[6].mxu0 }
 0x32d   :  { %v2506_v18 = vmax.f32 %v2910_v13, 0.0  ;;  %v2912_v19 = vadd.f32 %v2501_v17, %v2093_v10  ;;  %v2503_v20 = vpop.f32.mrb[7].mxu0 }
 0x32e   :  { %v2507_v23 = vmax.f32 %v2911_v15, 0.0  ;;  %v2913_v24 = vadd.f32 %v2503_v20, %v2097_v11 }
 0x32f   :  { %v2508_v27 = vmax.f32 %v2912_v19, 0.0  ;;  %v2510_v28 = vmul.f32 %v2506_v18, %v2506_v18 }
 0x330   :  { %v2509_v29 = vmax.f32 %v2913_v24, 0.0  ;;  %v2511_v8 = vmul.f32 %v2507_v23, %v2507_v23 }
 0x331   :  { %v2512_v30 = vmul.f32 %v2508_v27, %v2508_v27 }
 0x332   :  { %v2513_v31 = vmul.f32 %v2509_v29, %v2509_v29  ;;  %v2514_v61 = vadd.f32 %v2511_v8, %v2510_v28 }
 0x334   :  { %2515 = vadd.xlane.f32.xlu0 %v2514_v61  ;;  %v2517_v60 = vadd.f32 %v2513_v31, %v2512_v30 }
 0x338   :  { %2518 = vadd.xlane.f32.xlu0 %v2517_v60 }
 0x3c1   :  { %v2516_v63 = vpop.xlane.xlu0 %2515 }
 0x3c2   :  { %v2520_v21 = vmax.f32 %v2516_v63, 1e-24 }
 0x3c4   :  { %3428 = vrsqrt.f32 %v2520_v21 }
 0x3c5   :  { %v2519_v22 = vpop.xlane.xlu0 %2518 }
 0x3c6   :  { %v2521_v16 = vmax.f32 %v2519_v22, 1e-24 }
 0x3c8   :  { %3430 = vrsqrt.f32 %v2521_v16 }
 0x3ce   :  { %v3429_v32 = vpop.eup %3428 }
 0x3cf   :  { %v2524_v33 = vmul.f32 %v3429_v32, %v2506_v18  ;;  %v2525_v25 = vmul.f32 %v3429_v32, %v2507_v23 }
 0x3d1   :  { %vm2528_vm0 = vcmp.ne.f32.partialorder %v2524_v33, %v2524_v33  ;;  %vm2529_vm1 = vcmp.ne.f32.partialorder %v2525_v25, %v2525_v25 }
 0x3d2   :  { %v3431_v9 = vpop.eup %3430  ;;  %v2532_v34 = vsel %vm2528_vm0, 0.0, %v2524_v33  ;;  %v2533_v35 = vsel %vm2529_vm1, 0.0, %v2525_v25 }
 0x3d3   :  { %v2526_v38 = vmul.f32 %v3431_v9, %v2508_v27  ;;  %v2527_v36 = vmul.f32 %v3431_v9, %v2509_v29  ;;  %v2894_v55 = vclamps-f32 %v2532_v34, 3.4028235e+38  ;;  %v2895_v37 = vclamps-f32 %v2533_v35, 3.4028235e+38 }
 0x3d5   :  { %vm2530_vm2 = vcmp.ne.f32.partialorder %v2526_v38, %v2526_v38  ;;  %vm2531_vm3 = vcmp.ne.f32.partialorder %v2527_v36, %v2527_v36  ;;  %2544 = vst [vmem:[#allocation8] sm:$0xff] %v2894_v55  ;;  %2545 = vst [vmem:[#allocation8 + $0x8] sm:$0xff] %v2895_v37 }
 0x3d6   :  { %v2534_v39 = vsel %vm2530_vm2, 0.0, %v2526_v38  ;;  %v2535_v40 = vsel %vm2531_vm3, 0.0, %v2527_v36 }
 0x3d7   :  { %v2896_v41 = vclamps-f32 %v2534_v39, 3.4028235e+38  ;;  %v2897_v42 = vclamps-f32 %v2535_v40, 3.4028235e+38 }
 0x3d9   :  { %2546 = vst [vmem:[#allocation8 + $0x10] sm:$0xff] %v2896_v41  ;;  %2547 = vst [vmem:[#allocation8 + $0x18] sm:$0xff] %v2897_v42 }
 0x3da   :  { %3509 = shalt.err (!%p3506_p0)
}
 0x3db   :  { %s3510_s16 = scalar_lea.hbm %s3695_s5, 512 }
 0x3dc   :  { %p3511_p1 = scmp.ne.s32.totalorder %s3695_s5, %s3510_s16  ;;  %p3514_p2 = scmp.lt.u32.totalorder %s3510_s16, %s3695_s5 }
 0x3de   :  { %p3516_p3 = pnand %p3514_p2, %p3511_p1 }
 0x3e0   :  { %3519 = shalt.err (!%p3516_p3)
}
 0x3e1   :  { %2559 = dma.vmem_to_hbm [thread:$0]  %s2554_s12, 512, %s3695_s5, [#allocation4], %s3527_s28, %s3527_s28, %s3528_s29  }
 0x3e2   :  { %3524 = dma.done.wait [#allocation4], 512  }
 0x3e3   :  { %3525 = vsyncadd [#allocation4], 4294966784 }
 0x3e4   :  { %2563 = vsyncpa [#allocation3], 1 }
 0x3e5   :  { %2564 = vsyncpa [#allocation6], 1 }
 0x3e6   :  { %2565 = vsyncpa [#allocation4], 1 }

</bundles_post_ra>
